<compile_context>
chip_gen: v7x
topology: tpu7x:2x2x1
jax: 0.10.0
libtpu: 0.0.40
codegen_flags: <defaults>
</compile_context>

<pallas_src>
import functools

import jax
import jax.numpy as jnp
from jax import lax
from jax.experimental import pallas as pl
from jax.experimental.pallas import tpu as pltpu

_NEG = -1e30          # logit value for padded (fake) classes; exp underflows to 0
_SMALL_T = 16         # up to this T, fully unroll and keep hidden states in vregs
_MAX_UNROLL = 8       # bounded unroll for the fori_loop path (vreg pressure)


def gru_model_kernel(x_ref, wihT_ref, whhT_ref, b_i_ref, b_hn_ref,
                     woutT_ref, bout_ref, logp_ref, hn_ref, *scratch,
                     T, B, HP, small_t, use_bf16):
    """Full GRUModel forward in one kernel invocation.

    Refs:
      x_ref    : (T*B, E)     time-major inputs, flattened to rows
      wihT_ref : (E, 3*HP)    weight_ih_l0, transposed, gate blocks [r|z|n] each 128-lane padded
      whhT_ref : (HP, 3*HP)   weight_hh_l0, transposed, padded the same way
      b_i_ref  : (1, 3*HP)    combined input-side biases (r/z: b_ih+b_hh, n: b_ih), padded 0
      b_hn_ref : (1, HP)      hidden-side n bias (stays inside r*(...)), padded 0
      woutT_ref: (HP, CPAD)   output Linear weight, transposed + zero padded
      bout_ref : (1, CPAD)    output Linear bias, padded lanes = -1e30
      logp_ref : (T*B, CPAD)  log-softmax output (lane-dense)
      hn_ref   : (B, HP)      final hidden state (lane-dense, padded)
      scratch  : ()                                  if small_t
                 (gi_scr (T*B,3*HP), hs_scr (T*B,HP)) otherwise
    """
    HP2 = 2 * HP

    def mm(a, b):
        if use_bf16:
            a = a.astype(jnp.bfloat16)
            b = b.astype(jnp.bfloat16)
        return jnp.dot(a, b, preferred_element_type=jnp.float32)

    # Hoisted: weights/biases loaded once; input-side gate GEMM for ALL timesteps at once.
    whhT = whhT_ref[...]
    if use_bf16:
        whhT = whhT.astype(jnp.bfloat16)
    b_hn = b_hn_ref[...]
    gi_all = mm(x_ref[...], wihT_ref[...]) + b_i_ref[...]          # (T*B, 3*HP)

    def cell(gi, h):
        """One GRU step. gi: (B, 3*HP) precomputed input-side gates; h: (B, HP)."""
        gh = jnp.dot(h.astype(jnp.bfloat16) if use_bf16 else h, whhT,
                     preferred_element_type=jnp.float32)            # (B, 3*HP)
        # All slices below are at lane offsets 0 / HP / 2*HP (multiples of 128) -> free.
        rz = jax.nn.sigmoid(gi[:, :HP2] + gh[:, :HP2])              # (B, 2*HP)
        r = rz[:, :HP]
        z = rz[:, HP:]
        n = jnp.tanh(gi[:, HP2:] + r * (gh[:, HP2:] + b_hn))
        return (1.0 - z) * n + z * h

    h0 = jnp.zeros((B, HP), jnp.float32)                            # hidden=None -> zeros

    if small_t:
        # Fully unrolled; hidden states stay in vregs, no VMEM staging on the serial chain.
        h = h0
        hs_list = []
        for t in range(T):
            gi = gi_all[t * B:(t + 1) * B, :]                       # static sublane slice
            h = cell(gi, h)
            hs_list.append(h)
        hs = hs_list[0] if T == 1 else jnp.concatenate(hs_list, axis=0)   # (T*B, HP)
        h_last = h
    else:
        # Large-T path: flat (T*B, HP) staging scratch, bounded-unroll fori_loop.
        gi_scr, hs_scr = scratch
        gi_scr[...] = gi_all

        def step(t, h):
            start = pl.multiple_of(t * B, B)
            gi = gi_scr[pl.ds(start, B), :]
            h_new = cell(gi, h)
            hs_scr[pl.ds(start, B), :] = h_new
            return h_new

        h_last = lax.fori_loop(0, T, step, h0, unroll=min(T, _MAX_UNROLL))
        hs = hs_scr[...]                                            # (T*B, HP), no reshape

    hn_ref[...] = h_last.astype(hn_ref.dtype)

    # Fused output Linear + log-softmax over all T*B rows, lane-dense store.
    logits = mm(hs, woutT_ref[...]) + bout_ref[...]                 # (T*B, CPAD)
    m = jnp.max(logits, axis=-1, keepdims=True)
    lse = jnp.log(jnp.sum(jnp.exp(logits - m), axis=-1, keepdims=True)) + m
    logp_ref[...] = (logits - lse).astype(logp_ref.dtype)


@functools.partial(jax.jit, static_argnames=("use_bf16_matmul",))
def gru_model_forward(x, w_ih, w_hh, b_ih, b_hh, w_out, b_out, use_bf16_matmul=False):
    """Pallas implementation of GRUModel.forward(inp, hidden=None).

    Returns:
      logp        : (T*B, num_classes) log-softmax predictions
      next_hidden : (1, B, H) final GRU hidden state
    """
    T, B, E = x.shape
    H = w_hh.shape[1]
    C = w_out.shape[0]
    HP = ((H + 127) // 128) * 128                 # lane-padded hidden / gate block width
    CPAD = ((C + 127) // 128) * 128               # lane-dense class axis
    TB = T * B

    f32 = jnp.float32
    w_ih = jnp.asarray(w_ih, f32)
    w_hh = jnp.asarray(w_hh, f32)
    b_ih = jnp.asarray(b_ih, f32)
    b_hh = jnp.asarray(b_hh, f32)

    # ---- one-time weight/bias preparation (outside the kernel) ----
    # Gate blocks [r | z | n], each padded to HP lanes so in-kernel slices are lane-aligned.
    wihT = jnp.zeros((E, 3 * HP), f32)
    whhT = jnp.zeros((HP, 3 * HP), f32)
    b_i = jnp.zeros((1, 3 * HP), f32)
    b_hn = jnp.zeros((1, HP), f32)
    for g in range(3):
        wihT = wihT.at[:, g * HP:g * HP + H].set(w_ih[g * H:(g + 1) * H, :].T)
        whhT = whhT.at[:H, g * HP:g * HP + H].set(w_hh[g * H:(g + 1) * H, :].T)
    # r/z: b_ih + b_hh combined; n: only b_ih (b_hh_n stays inside r*(...)).
    b_i = b_i.at[0, 0 * HP:0 * HP + H].set(b_ih[0 * H:1 * H] + b_hh[0 * H:1 * H])
    b_i = b_i.at[0, 1 * HP:1 * HP + H].set(b_ih[1 * H:2 * H] + b_hh[1 * H:2 * H])
    b_i = b_i.at[0, 2 * HP:2 * HP + H].set(b_ih[2 * H:3 * H])
    b_hn = b_hn.at[0, :H].set(b_hh[2 * H:3 * H])

    woutT = jnp.zeros((HP, CPAD), f32).at[:H, :C].set(jnp.asarray(w_out, f32).T)
    boutp = jnp.full((1, CPAD), _NEG, f32).at[0, :C].set(jnp.asarray(b_out, f32))

    x_flat = jnp.asarray(x, f32).reshape(TB, E)

    small_t = T <= _SMALL_T
    scratch = [] if small_t else [pltpu.VMEM((TB, 3 * HP), f32),
                                  pltpu.VMEM((TB, HP), f32)]

    vmem = pl.BlockSpec(memory_space=pltpu.MemorySpace.VMEM)
    kernel = functools.partial(gru_model_kernel, T=T, B=B, HP=HP,
                               small_t=small_t, use_bf16=use_bf16_matmul)

    logp_pad, hn_pad = pl.pallas_call(
        kernel,
        out_shape=(
            jax.ShapeDtypeStruct((TB, CPAD), f32),
            jax.ShapeDtypeStruct((B, HP), f32),
        ),
        in_specs=[vmem] * 7,
        out_specs=(vmem, vmem),
        scratch_shapes=scratch,
    )(x_flat, wihT, whhT, b_i, b_hn, woutT, boutp)

    # The slice is a tiny extra HBM pass at these shapes; downstream consumers (NLLLoss
    # gather) could instead take the padded (TB, CPAD) buffer directly.
    logp = logp_pad[:, :C]                    # output.view(-1, num_classes) + LogSoftmax
    next_hidden = hn_pad[:, :H].reshape(1, B, H)
    return logp, next_hidden


def gru_model_reference(x, w_ih, w_hh, b_ih, b_hh, w_out, b_out):
    """Pure-JAX reference with PyTorch nn.GRU semantics (1 layer, unidirectional)."""
    T, B, E = x.shape
    H = w_hh.shape[1]
    C = w_out.shape[0]

    def step(h, xt):
        gi = xt @ w_ih.T + b_ih       # (B, 3H)
        gh = h @ w_hh.T + b_hh        # (B, 3H)
        i_r, i_z, i_n = jnp.split(gi, 3, axis=-1)
        h_r, h_z, h_n = jnp.split(gh, 3, axis=-1)
        r = jax.nn.sigmoid(i_r + h_r)
        z = jax.nn.sigmoid(i_z + h_z)
        n = jnp.tanh(i_n + r * h_n)
        h_new = (1.0 - z) * n + z * h
        return h_new, h_new

    h0 = jnp.zeros((B, H), jnp.float32)
    h_last, hs = jax.lax.scan(step, h0, x)
    logits = hs @ w_out.T + b_out                 # (T, B, C)
    logp = jax.nn.log_softmax(logits.reshape(T * B, C), axis=-1)
    return logp, h_last.reshape(1, B, H)


if __name__ == "__main__":
    # Small shapes consistent with the module:
    #   one "tweet": seq_len=8, batch_size=1 (module fixes batch_size=1),
    #   embedding input_size=16, hidden_size_rnn=32, num_classes=10.
    T, B, E, H, C = 8, 1, 16, 32, 10

    key = jax.random.PRNGKey(0)
    k_x, k_wih, k_whh, k_bih, k_bhh, k_wo, k_bo = jax.random.split(key, 7)

    k = 1.0 / jnp.sqrt(jnp.float32(H))  # PyTorch-style uniform(-1/sqrt(H), 1/sqrt(H))
    x = jax.random.normal(k_x, (T, B, E), jnp.float32)
    w_ih = jax.random.uniform(k_wih, (3 * H, E), jnp.float32, -k, k)
    w_hh = jax.random.uniform(k_whh, (3 * H, H), jnp.float32, -k, k)
    b_ih = jax.random.uniform(k_bih, (3 * H,), jnp.float32, -k, k)
    b_hh = jax.random.uniform(k_bhh, (3 * H,), jnp.float32, -k, k)
    w_out = jax.random.uniform(k_wo, (C, H), jnp.float32, -k, k)
    b_out = jax.random.uniform(k_bo, (C,), jnp.float32, -k, k)

    logp, next_hidden = gru_model_forward(x, w_ih, w_hh, b_ih, b_hh, w_out, b_out)
    jax.block_until_ready((logp, next_hidden))

    logp_ref, hidden_ref = gru_model_reference(x, w_ih, w_hh, b_ih, b_hh, w_out, b_out)
    assert logp.shape == (T * B, C)
    assert next_hidden.shape == (1, B, H)
    assert jnp.allclose(logp, logp_ref, atol=2e-3, rtol=2e-3), "log-softmax mismatch"
    assert jnp.allclose(next_hidden, hidden_ref, atol=2e-3, rtol=2e-3), "hidden mismatch"

    print("KERNEL_OK")
</pallas_src>

<mosaic_0001>
module attributes {stable_mosaic.version = 11 : i64} {
  func.func @gru_model_kernel(%arg0: memref<8x16xf32, #tpu.memory_space<vmem>>, %arg1: memref<16x384xf32, #tpu.memory_space<vmem>>, %arg2: memref<128x384xf32, #tpu.memory_space<vmem>>, %arg3: memref<1x384xf32, #tpu.memory_space<vmem>>, %arg4: memref<1x128xf32, #tpu.memory_space<vmem>>, %arg5: memref<128x128xf32, #tpu.memory_space<vmem>>, %arg6: memref<1x128xf32, #tpu.memory_space<vmem>>, %arg7: memref<8x128xf32, #tpu.memory_space<vmem>>, %arg8: memref<1x128xf32, #tpu.memory_space<vmem>>) attributes {dimension_semantics = [], scalar_prefetch = 0 : i64, scratch_operands = 0 : i64, tpu.core_type = #tpu.core_type<tc>} {
    %c0 = arith.constant 0 : index
    %c0_0 = arith.constant 0 : index
    %0 = vector.load %arg2[%c0, %c0_0] : memref<128x384xf32, #tpu.memory_space<vmem>>, vector<128x384xf32>
    %c0_1 = arith.constant 0 : index
    %c0_2 = arith.constant 0 : index
    %1 = vector.load %arg4[%c0_1, %c0_2] : memref<1x128xf32, #tpu.memory_space<vmem>>, vector<1x128xf32>
    %c0_3 = arith.constant 0 : index
    %c0_4 = arith.constant 0 : index
    %2 = vector.load %arg0[%c0_3, %c0_4] : memref<8x16xf32, #tpu.memory_space<vmem>>, vector<8x16xf32>
    %c0_5 = arith.constant 0 : index
    %c0_6 = arith.constant 0 : index
    %3 = vector.load %arg1[%c0_5, %c0_6] : memref<16x384xf32, #tpu.memory_space<vmem>>, vector<16x384xf32>
    %cst = arith.constant dense<0.000000e+00> : vector<8x384xf32>
    %4 = tpu.matmul %2, %3, %cst {dimension_numbers = #tpu.dot_dimension_numbers<[1], [0], [0], [1], [0, 0, 1, 1], [], []>} : vector<8x16xf32>, vector<16x384xf32>, vector<8x384xf32> -> vector<8x384xf32>
    %c0_7 = arith.constant 0 : index
    %c0_8 = arith.constant 0 : index
    %5 = vector.load %arg3[%c0_7, %c0_8] : memref<1x384xf32, #tpu.memory_space<vmem>>, vector<1x384xf32>
    %6 = vector.broadcast %5 : vector<1x384xf32> to vector<8x384xf32>
    %7 = arith.addf %4, %6 : vector<8x384xf32>
    %cst_9 = arith.constant 0.000000e+00 : f32
    %8 = vector.broadcast %cst_9 : f32 to vector<1x128xf32>
    %9 = vector.extract_strided_slice %7 {offsets = [0, 0], sizes = [1, 384], strides = [1, 1]} : vector<8x384xf32> to vector<1x384xf32>
    %cst_10 = arith.constant dense<0.000000e+00> : vector<1x384xf32>
    %10 = tpu.matmul %8, %0, %cst_10 {dimension_numbers = #tpu.dot_dimension_numbers<[1], [0], [0], [1], [0, 0, 1, 1], [], []>} : vector<1x128xf32>, vector<128x384xf32>, vector<1x384xf32> -> vector<1x384xf32>
    %11 = vector.extract_strided_slice %9 {offsets = [0, 0], sizes = [1, 256], strides = [1, 1]} : vector<1x384xf32> to vector<1x256xf32>
    %12 = vector.extract_strided_slice %10 {offsets = [0, 0], sizes = [1, 256], strides = [1, 1]} : vector<1x384xf32> to vector<1x256xf32>
    %13 = arith.addf %11, %12 : vector<1x256xf32>
    %14 = arith.negf %13 : vector<1x256xf32>
    %15 = math.exp %14 : vector<1x256xf32>
    %cst_11 = arith.constant 1.000000e+00 : f32
    %16 = vector.broadcast %cst_11 : f32 to vector<1x256xf32>
    %17 = arith.addf %16, %15 : vector<1x256xf32>
    %18 = arith.divf %16, %17 : vector<1x256xf32>
    %19 = vector.extract_strided_slice %18 {offsets = [0, 0], sizes = [1, 128], strides = [1, 1]} : vector<1x256xf32> to vector<1x128xf32>
    %20 = vector.extract_strided_slice %18 {offsets = [0, 128], sizes = [1, 128], strides = [1, 1]} : vector<1x256xf32> to vector<1x128xf32>
    %21 = vector.extract_strided_slice %9 {offsets = [0, 256], sizes = [1, 128], strides = [1, 1]} : vector<1x384xf32> to vector<1x128xf32>
    %22 = vector.extract_strided_slice %10 {offsets = [0, 256], sizes = [1, 128], strides = [1, 1]} : vector<1x384xf32> to vector<1x128xf32>
    %23 = arith.addf %22, %1 : vector<1x128xf32>
    %24 = arith.mulf %19, %23 : vector<1x128xf32>
    %25 = arith.addf %21, %24 : vector<1x128xf32>
    %26 = math.tanh %25 : vector<1x128xf32>
    %cst_12 = arith.constant 1.000000e+00 : f32
    %27 = vector.broadcast %cst_12 : f32 to vector<1x128xf32>
    %28 = arith.subf %27, %20 : vector<1x128xf32>
    %29 = arith.mulf %28, %26 : vector<1x128xf32>
    %30 = arith.mulf %20, %8 : vector<1x128xf32>
    %31 = arith.addf %29, %30 : vector<1x128xf32>
    %32 = vector.extract_strided_slice %7 {offsets = [1, 0], sizes = [1, 384], strides = [1, 1]} : vector<8x384xf32> to vector<1x384xf32>
    %cst_13 = arith.constant dense<0.000000e+00> : vector<1x384xf32>
    %33 = tpu.matmul %31, %0, %cst_13 {dimension_numbers = #tpu.dot_dimension_numbers<[1], [0], [0], [1], [0, 0, 1, 1], [], []>} : vector<1x128xf32>, vector<128x384xf32>, vector<1x384xf32> -> vector<1x384xf32>
    %34 = vector.extract_strided_slice %32 {offsets = [0, 0], sizes = [1, 256], strides = [1, 1]} : vector<1x384xf32> to vector<1x256xf32>
    %35 = vector.extract_strided_slice %33 {offsets = [0, 0], sizes = [1, 256], strides = [1, 1]} : vector<1x384xf32> to vector<1x256xf32>
    %36 = arith.addf %34, %35 : vector<1x256xf32>
    %37 = arith.negf %36 : vector<1x256xf32>
    %38 = math.exp %37 : vector<1x256xf32>
    %cst_14 = arith.constant 1.000000e+00 : f32
    %39 = vector.broadcast %cst_14 : f32 to vector<1x256xf32>
    %40 = arith.addf %39, %38 : vector<1x256xf32>
    %41 = arith.divf %39, %40 : vector<1x256xf32>
    %42 = vector.extract_strided_slice %41 {offsets = [0, 0], sizes = [1, 128], strides = [1, 1]} : vector<1x256xf32> to vector<1x128xf32>
    %43 = vector.extract_strided_slice %41 {offsets = [0, 128], sizes = [1, 128], strides = [1, 1]} : vector<1x256xf32> to vector<1x128xf32>
    %44 = vector.extract_strided_slice %32 {offsets = [0, 256], sizes = [1, 128], strides = [1, 1]} : vector<1x384xf32> to vector<1x128xf32>
    %45 = vector.extract_strided_slice %33 {offsets = [0, 256], sizes = [1, 128], strides = [1, 1]} : vector<1x384xf32> to vector<1x128xf32>
    %46 = arith.addf %45, %1 : vector<1x128xf32>
    %47 = arith.mulf %42, %46 : vector<1x128xf32>
    %48 = arith.addf %44, %47 : vector<1x128xf32>
    %49 = math.tanh %48 : vector<1x128xf32>
    %cst_15 = arith.constant 1.000000e+00 : f32
    %50 = vector.broadcast %cst_15 : f32 to vector<1x128xf32>
    %51 = arith.subf %50, %43 : vector<1x128xf32>
    %52 = arith.mulf %51, %49 : vector<1x128xf32>
    %53 = arith.mulf %43, %31 : vector<1x128xf32>
    %54 = arith.addf %52, %53 : vector<1x128xf32>
    %55 = vector.extract_strided_slice %7 {offsets = [2, 0], sizes = [1, 384], strides = [1, 1]} : vector<8x384xf32> to vector<1x384xf32>
    %cst_16 = arith.constant dense<0.000000e+00> : vector<1x384xf32>
    %56 = tpu.matmul %54, %0, %cst_16 {dimension_numbers = #tpu.dot_dimension_numbers<[1], [0], [0], [1], [0, 0, 1, 1], [], []>} : vector<1x128xf32>, vector<128x384xf32>, vector<1x384xf32> -> vector<1x384xf32>
    %57 = vector.extract_strided_slice %55 {offsets = [0, 0], sizes = [1, 256], strides = [1, 1]} : vector<1x384xf32> to vector<1x256xf32>
    %58 = vector.extract_strided_slice %56 {offsets = [0, 0], sizes = [1, 256], strides = [1, 1]} : vector<1x384xf32> to vector<1x256xf32>
    %59 = arith.addf %57, %58 : vector<1x256xf32>
    %60 = arith.negf %59 : vector<1x256xf32>
    %61 = math.exp %60 : vector<1x256xf32>
    %cst_17 = arith.constant 1.000000e+00 : f32
    %62 = vector.broadcast %cst_17 : f32 to vector<1x256xf32>
    %63 = arith.addf %62, %61 : vector<1x256xf32>
    %64 = arith.divf %62, %63 : vector<1x256xf32>
    %65 = vector.extract_strided_slice %64 {offsets = [0, 0], sizes = [1, 128], strides = [1, 1]} : vector<1x256xf32> to vector<1x128xf32>
    %66 = vector.extract_strided_slice %64 {offsets = [0, 128], sizes = [1, 128], strides = [1, 1]} : vector<1x256xf32> to vector<1x128xf32>
    %67 = vector.extract_strided_slice %55 {offsets = [0, 256], sizes = [1, 128], strides = [1, 1]} : vector<1x384xf32> to vector<1x128xf32>
    %68 = vector.extract_strided_slice %56 {offsets = [0, 256], sizes = [1, 128], strides = [1, 1]} : vector<1x384xf32> to vector<1x128xf32>
    %69 = arith.addf %68, %1 : vector<1x128xf32>
    %70 = arith.mulf %65, %69 : vector<1x128xf32>
    %71 = arith.addf %67, %70 : vector<1x128xf32>
    %72 = math.tanh %71 : vector<1x128xf32>
    %cst_18 = arith.constant 1.000000e+00 : f32
    %73 = vector.broadcast %cst_18 : f32 to vector<1x128xf32>
    %74 = arith.subf %73, %66 : vector<1x128xf32>
    %75 = arith.mulf %74, %72 : vector<1x128xf32>
    %76 = arith.mulf %66, %54 : vector<1x128xf32>
    %77 = arith.addf %75, %76 : vector<1x128xf32>
    %78 = vector.extract_strided_slice %7 {offsets = [3, 0], sizes = [1, 384], strides = [1, 1]} : vector<8x384xf32> to vector<1x384xf32>
    %cst_19 = arith.constant dense<0.000000e+00> : vector<1x384xf32>
    %79 = tpu.matmul %77, %0, %cst_19 {dimension_numbers = #tpu.dot_dimension_numbers<[1], [0], [0], [1], [0, 0, 1, 1], [], []>} : vector<1x128xf32>, vector<128x384xf32>, vector<1x384xf32> -> vector<1x384xf32>
    %80 = vector.extract_strided_slice %78 {offsets = [0, 0], sizes = [1, 256], strides = [1, 1]} : vector<1x384xf32> to vector<1x256xf32>
    %81 = vector.extract_strided_slice %79 {offsets = [0, 0], sizes = [1, 256], strides = [1, 1]} : vector<1x384xf32> to vector<1x256xf32>
    %82 = arith.addf %80, %81 : vector<1x256xf32>
    %83 = arith.negf %82 : vector<1x256xf32>
    %84 = math.exp %83 : vector<1x256xf32>
    %cst_20 = arith.constant 1.000000e+00 : f32
    %85 = vector.broadcast %cst_20 : f32 to vector<1x256xf32>
    %86 = arith.addf %85, %84 : vector<1x256xf32>
    %87 = arith.divf %85, %86 : vector<1x256xf32>
    %88 = vector.extract_strided_slice %87 {offsets = [0, 0], sizes = [1, 128], strides = [1, 1]} : vector<1x256xf32> to vector<1x128xf32>
    %89 = vector.extract_strided_slice %87 {offsets = [0, 128], sizes = [1, 128], strides = [1, 1]} : vector<1x256xf32> to vector<1x128xf32>
    %90 = vector.extract_strided_slice %78 {offsets = [0, 256], sizes = [1, 128], strides = [1, 1]} : vector<1x384xf32> to vector<1x128xf32>
    %91 = vector.extract_strided_slice %79 {offsets = [0, 256], sizes = [1, 128], strides = [1, 1]} : vector<1x384xf32> to vector<1x128xf32>
    %92 = arith.addf %91, %1 : vector<1x128xf32>
    %93 = arith.mulf %88, %92 : vector<1x128xf32>
    %94 = arith.addf %90, %93 : vector<1x128xf32>
    %95 = math.tanh %94 : vector<1x128xf32>
    %cst_21 = arith.constant 1.000000e+00 : f32
    %96 = vector.broadcast %cst_21 : f32 to vector<1x128xf32>
    %97 = arith.subf %96, %89 : vector<1x128xf32>
    %98 = arith.mulf %97, %95 : vector<1x128xf32>
    %99 = arith.mulf %89, %77 : vector<1x128xf32>
    %100 = arith.addf %98, %99 : vector<1x128xf32>
    %101 = vector.extract_strided_slice %7 {offsets = [4, 0], sizes = [1, 384], strides = [1, 1]} : vector<8x384xf32> to vector<1x384xf32>
    %cst_22 = arith.constant dense<0.000000e+00> : vector<1x384xf32>
    %102 = tpu.matmul %100, %0, %cst_22 {dimension_numbers = #tpu.dot_dimension_numbers<[1], [0], [0], [1], [0, 0, 1, 1], [], []>} : vector<1x128xf32>, vector<128x384xf32>, vector<1x384xf32> -> vector<1x384xf32>
    %103 = vector.extract_strided_slice %101 {offsets = [0, 0], sizes = [1, 256], strides = [1, 1]} : vector<1x384xf32> to vector<1x256xf32>
    %104 = vector.extract_strided_slice %102 {offsets = [0, 0], sizes = [1, 256], strides = [1, 1]} : vector<1x384xf32> to vector<1x256xf32>
    %105 = arith.addf %103, %104 : vector<1x256xf32>
    %106 = arith.negf %105 : vector<1x256xf32>
    %107 = math.exp %106 : vector<1x256xf32>
    %cst_23 = arith.constant 1.000000e+00 : f32
    %108 = vector.broadcast %cst_23 : f32 to vector<1x256xf32>
    %109 = arith.addf %108, %107 : vector<1x256xf32>
    %110 = arith.divf %108, %109 : vector<1x256xf32>
    %111 = vector.extract_strided_slice %110 {offsets = [0, 0], sizes = [1, 128], strides = [1, 1]} : vector<1x256xf32> to vector<1x128xf32>
    %112 = vector.extract_strided_slice %110 {offsets = [0, 128], sizes = [1, 128], strides = [1, 1]} : vector<1x256xf32> to vector<1x128xf32>
    %113 = vector.extract_strided_slice %101 {offsets = [0, 256], sizes = [1, 128], strides = [1, 1]} : vector<1x384xf32> to vector<1x128xf32>
    %114 = vector.extract_strided_slice %102 {offsets = [0, 256], sizes = [1, 128], strides = [1, 1]} : vector<1x384xf32> to vector<1x128xf32>
    %115 = arith.addf %114, %1 : vector<1x128xf32>
    %116 = arith.mulf %111, %115 : vector<1x128xf32>
    %117 = arith.addf %113, %116 : vector<1x128xf32>
    %118 = math.tanh %117 : vector<1x128xf32>
    %cst_24 = arith.constant 1.000000e+00 : f32
    %119 = vector.broadcast %cst_24 : f32 to vector<1x128xf32>
    %120 = arith.subf %119, %112 : vector<1x128xf32>
    %121 = arith.mulf %120, %118 : vector<1x128xf32>
    %122 = arith.mulf %112, %100 : vector<1x128xf32>
    %123 = arith.addf %121, %122 : vector<1x128xf32>
    %124 = vector.extract_strided_slice %7 {offsets = [5, 0], sizes = [1, 384], strides = [1, 1]} : vector<8x384xf32> to vector<1x384xf32>
    %cst_25 = arith.constant dense<0.000000e+00> : vector<1x384xf32>
    %125 = tpu.matmul %123, %0, %cst_25 {dimension_numbers = #tpu.dot_dimension_numbers<[1], [0], [0], [1], [0, 0, 1, 1], [], []>} : vector<1x128xf32>, vector<128x384xf32>, vector<1x384xf32> -> vector<1x384xf32>
    %126 = vector.extract_strided_slice %124 {offsets = [0, 0], sizes = [1, 256], strides = [1, 1]} : vector<1x384xf32> to vector<1x256xf32>
    %127 = vector.extract_strided_slice %125 {offsets = [0, 0], sizes = [1, 256], strides = [1, 1]} : vector<1x384xf32> to vector<1x256xf32>
    %128 = arith.addf %126, %127 : vector<1x256xf32>
    %129 = arith.negf %128 : vector<1x256xf32>
    %130 = math.exp %129 : vector<1x256xf32>
    %cst_26 = arith.constant 1.000000e+00 : f32
    %131 = vector.broadcast %cst_26 : f32 to vector<1x256xf32>
    %132 = arith.addf %131, %130 : vector<1x256xf32>
    %133 = arith.divf %131, %132 : vector<1x256xf32>
    %134 = vector.extract_strided_slice %133 {offsets = [0, 0], sizes = [1, 128], strides = [1, 1]} : vector<1x256xf32> to vector<1x128xf32>
    %135 = vector.extract_strided_slice %133 {offsets = [0, 128], sizes = [1, 128], strides = [1, 1]} : vector<1x256xf32> to vector<1x128xf32>
    %136 = vector.extract_strided_slice %124 {offsets = [0, 256], sizes = [1, 128], strides = [1, 1]} : vector<1x384xf32> to vector<1x128xf32>
    %137 = vector.extract_strided_slice %125 {offsets = [0, 256], sizes = [1, 128], strides = [1, 1]} : vector<1x384xf32> to vector<1x128xf32>
    %138 = arith.addf %137, %1 : vector<1x128xf32>
    %139 = arith.mulf %134, %138 : vector<1x128xf32>
    %140 = arith.addf %136, %139 : vector<1x128xf32>
    %141 = math.tanh %140 : vector<1x128xf32>
    %cst_27 = arith.constant 1.000000e+00 : f32
    %142 = vector.broadcast %cst_27 : f32 to vector<1x128xf32>
    %143 = arith.subf %142, %135 : vector<1x128xf32>
    %144 = arith.mulf %143, %141 : vector<1x128xf32>
    %145 = arith.mulf %135, %123 : vector<1x128xf32>
    %146 = arith.addf %144, %145 : vector<1x128xf32>
    %147 = vector.extract_strided_slice %7 {offsets = [6, 0], sizes = [1, 384], strides = [1, 1]} : vector<8x384xf32> to vector<1x384xf32>
    %cst_28 = arith.constant dense<0.000000e+00> : vector<1x384xf32>
    %148 = tpu.matmul %146, %0, %cst_28 {dimension_numbers = #tpu.dot_dimension_numbers<[1], [0], [0], [1], [0, 0, 1, 1], [], []>} : vector<1x128xf32>, vector<128x384xf32>, vector<1x384xf32> -> vector<1x384xf32>
    %149 = vector.extract_strided_slice %147 {offsets = [0, 0], sizes = [1, 256], strides = [1, 1]} : vector<1x384xf32> to vector<1x256xf32>
    %150 = vector.extract_strided_slice %148 {offsets = [0, 0], sizes = [1, 256], strides = [1, 1]} : vector<1x384xf32> to vector<1x256xf32>
    %151 = arith.addf %149, %150 : vector<1x256xf32>
    %152 = arith.negf %151 : vector<1x256xf32>
    %153 = math.exp %152 : vector<1x256xf32>
    %cst_29 = arith.constant 1.000000e+00 : f32
    %154 = vector.broadcast %cst_29 : f32 to vector<1x256xf32>
    %155 = arith.addf %154, %153 : vector<1x256xf32>
    %156 = arith.divf %154, %155 : vector<1x256xf32>
    %157 = vector.extract_strided_slice %156 {offsets = [0, 0], sizes = [1, 128], strides = [1, 1]} : vector<1x256xf32> to vector<1x128xf32>
    %158 = vector.extract_strided_slice %156 {offsets = [0, 128], sizes = [1, 128], strides = [1, 1]} : vector<1x256xf32> to vector<1x128xf32>
    %159 = vector.extract_strided_slice %147 {offsets = [0, 256], sizes = [1, 128], strides = [1, 1]} : vector<1x384xf32> to vector<1x128xf32>
    %160 = vector.extract_strided_slice %148 {offsets = [0, 256], sizes = [1, 128], strides = [1, 1]} : vector<1x384xf32> to vector<1x128xf32>
    %161 = arith.addf %160, %1 : vector<1x128xf32>
    %162 = arith.mulf %157, %161 : vector<1x128xf32>
    %163 = arith.addf %159, %162 : vector<1x128xf32>
    %164 = math.tanh %163 : vector<1x128xf32>
    %cst_30 = arith.constant 1.000000e+00 : f32
    %165 = vector.broadcast %cst_30 : f32 to vector<1x128xf32>
    %166 = arith.subf %165, %158 : vector<1x128xf32>
    %167 = arith.mulf %166, %164 : vector<1x128xf32>
    %168 = arith.mulf %158, %146 : vector<1x128xf32>
    %169 = arith.addf %167, %168 : vector<1x128xf32>
    %170 = vector.extract_strided_slice %7 {offsets = [7, 0], sizes = [1, 384], strides = [1, 1]} : vector<8x384xf32> to vector<1x384xf32>
    %cst_31 = arith.constant dense<0.000000e+00> : vector<1x384xf32>
    %171 = tpu.matmul %169, %0, %cst_31 {dimension_numbers = #tpu.dot_dimension_numbers<[1], [0], [0], [1], [0, 0, 1, 1], [], []>} : vector<1x128xf32>, vector<128x384xf32>, vector<1x384xf32> -> vector<1x384xf32>
    %172 = vector.extract_strided_slice %170 {offsets = [0, 0], sizes = [1, 256], strides = [1, 1]} : vector<1x384xf32> to vector<1x256xf32>
    %173 = vector.extract_strided_slice %171 {offsets = [0, 0], sizes = [1, 256], strides = [1, 1]} : vector<1x384xf32> to vector<1x256xf32>
    %174 = arith.addf %172, %173 : vector<1x256xf32>
    %175 = arith.negf %174 : vector<1x256xf32>
    %176 = math.exp %175 : vector<1x256xf32>
    %cst_32 = arith.constant 1.000000e+00 : f32
    %177 = vector.broadcast %cst_32 : f32 to vector<1x256xf32>
    %178 = arith.addf %177, %176 : vector<1x256xf32>
    %179 = arith.divf %177, %178 : vector<1x256xf32>
    %180 = vector.extract_strided_slice %179 {offsets = [0, 0], sizes = [1, 128], strides = [1, 1]} : vector<1x256xf32> to vector<1x128xf32>
    %181 = vector.extract_strided_slice %179 {offsets = [0, 128], sizes = [1, 128], strides = [1, 1]} : vector<1x256xf32> to vector<1x128xf32>
    %182 = vector.extract_strided_slice %170 {offsets = [0, 256], sizes = [1, 128], strides = [1, 1]} : vector<1x384xf32> to vector<1x128xf32>
    %183 = vector.extract_strided_slice %171 {offsets = [0, 256], sizes = [1, 128], strides = [1, 1]} : vector<1x384xf32> to vector<1x128xf32>
    %184 = arith.addf %183, %1 : vector<1x128xf32>
    %185 = arith.mulf %180, %184 : vector<1x128xf32>
    %186 = arith.addf %182, %185 : vector<1x128xf32>
    %187 = math.tanh %186 : vector<1x128xf32>
    %cst_33 = arith.constant 1.000000e+00 : f32
    %188 = vector.broadcast %cst_33 : f32 to vector<1x128xf32>
    %189 = arith.subf %188, %181 : vector<1x128xf32>
    %190 = arith.mulf %189, %187 : vector<1x128xf32>
    %191 = arith.mulf %181, %169 : vector<1x128xf32>
    %192 = arith.addf %190, %191 : vector<1x128xf32>
    %193 = tpu.concatenate %31, %54, %77, %100, %123, %146, %169, %192 in 0 : vector<1x128xf32>, vector<1x128xf32>, vector<1x128xf32>, vector<1x128xf32>, vector<1x128xf32>, vector<1x128xf32>, vector<1x128xf32>, vector<1x128xf32> -> vector<8x128xf32>
    %c0_34 = arith.constant 0 : index
    %c0_35 = arith.constant 0 : index
    %194 = vector.load %arg8[%c0_34, %c0_35] : memref<1x128xf32, #tpu.memory_space<vmem>>, vector<1x128xf32>
    tpu.vector_store %arg8[%c0_34, %c0_35], %192 {strides = array<i32>} : memref<1x128xf32, #tpu.memory_space<vmem>>, vector<1x128xf32>,
    %c0_36 = arith.constant 0 : index
    %c0_37 = arith.constant 0 : index
    %195 = vector.load %arg5[%c0_36, %c0_37] : memref<128x128xf32, #tpu.memory_space<vmem>>, vector<128x128xf32>
    %cst_38 = arith.constant dense<0.000000e+00> : vector<8x128xf32>
    %196 = tpu.matmul %193, %195, %cst_38 {dimension_numbers = #tpu.dot_dimension_numbers<[1], [0], [0], [1], [0, 0, 1, 1], [], []>} : vector<8x128xf32>, vector<128x128xf32>, vector<8x128xf32> -> vector<8x128xf32>
    %c0_39 = arith.constant 0 : index
    %c0_40 = arith.constant 0 : index
    %197 = vector.load %arg6[%c0_39, %c0_40] : memref<1x128xf32, #tpu.memory_space<vmem>>, vector<1x128xf32>
    %198 = vector.broadcast %197 : vector<1x128xf32> to vector<8x128xf32>
    %199 = arith.addf %196, %198 : vector<8x128xf32>
    %cst_41 = arith.constant dense<0xFF800000> : vector<8xf32>
    %200 = vector.multi_reduction <maximumf>, %199, %cst_41 [1] : vector<8x128xf32> to vector<8xf32>
    %201 = vector.shape_cast %200 : vector<8xf32> to vector<8x1xf32>
    %202 = vector.broadcast %201 : vector<8x1xf32> to vector<8x128xf32>
    %203 = arith.subf %199, %202 : vector<8x128xf32>
    %204 = math.exp %203 : vector<8x128xf32>
    %cst_42 = arith.constant dense<0.000000e+00> : vector<8xf32>
    %205 = vector.multi_reduction <add>, %204, %cst_42 [1] : vector<8x128xf32> to vector<8xf32>
    %206 = vector.shape_cast %205 : vector<8xf32> to vector<8x1xf32>
    %207 = math.log %206 : vector<8x1xf32>
    %208 = arith.addf %207, %201 : vector<8x1xf32>
    %209 = vector.broadcast %208 : vector<8x1xf32> to vector<8x128xf32>
    %210 = arith.subf %199, %209 : vector<8x128xf32>
    %c0_43 = arith.constant 0 : index
    %c0_44 = arith.constant 0 : index
    %211 = vector.load %arg7[%c0_43, %c0_44] : memref<8x128xf32, #tpu.memory_space<vmem>>, vector<8x128xf32>
    tpu.vector_store %arg7[%c0_43, %c0_44], %210 {strides = array<i32>} : memref<8x128xf32, #tpu.memory_space<vmem>>, vector<8x128xf32>,
    return
  }
}

</mosaic_0001>

<bundles_post_ra>
// kernel: gru_model_forward.1
= control target key start
LH: loop header
LB: loop body
LE: loop exit
PB: predicated region body
PF: predicated region fallthrough
CT: control target
= control target key end

     0   :  { %v2873_v7 = vmov 0.0   ;;  %vm102_vm0 = vcmask 130048   ;;  %v2874_v35 = vmov 0.0|0.0   ;;  %vm2875_vm1 = vmmov 0   ;;  %s3596_s0 = inlined_call_operand.vmem [shape: f32[8,16], index: 0, kind: input, shape index: {}]   ;;  %s3597_s1 = inlined_call_operand.vmem [shape: f32[16,384], index: 1, kind: input, shape index: {}]   ;;  %s3598_s2 = inlined_call_operand.vmem [shape: f32[128,384], index: 2, kind: input, shape index: {}]   ;;  %s3599_s3 = inlined_call_operand.vmem [shape: f32[1,384], index: 3, kind: input, shape index: {}]   ;;  %s3600_s4 = inlined_call_operand.vmem [shape: f32[1,128], index: 4, kind: input, shape index: {}]   ;;  %s3601_s5 = inlined_call_operand.vmem [shape: f32[128,128], index: 5, kind: input, shape index: {}]   ;;  %s3602_s6 = inlined_call_operand.vmem [shape: f32[1,128], index: 6, kind: input, shape index: {}]   ;;  %s3603_s7 = inlined_call_operand.hbm [shape: f32[8,128], index: 7, kind: output, shape index: {0}]   ;;  %s3604_s8 = inlined_call_operand.vmem [shape: f32[1,128], index: 8, kind: output, shape index: {1}]  }
   0x1   :  { %v30_v0 = vld [vmem:[%s3598_s2 + $0x8] sm:$0xff]  ;;  %v33_v1 = vld [vmem:[%s3598_s2 + $0x20] sm:$0xff]  ;;  %v32_v4 = vld [vmem:[%s3598_s2 + $0x18] sm:$0xff]  ;;  %170 = vmatprep.mubr.f32.mxu1 %v2873_v7  ;;  %311 = vmatprep.mubr.f32.mxu0 %v2873_v7 }
   0x2   :  { %v29_v2 = vld [vmem:[%s3598_s2] sm:$0xff]  ;;  %v2931_v3 = vpack.c.bf16 %v33_v1, %v30_v0  ;;  %v36_v5 = vld [vmem:[%s3598_s2 + $0x38] sm:$0xff]  ;;  %v39_v6 = vld [vmem:[%s3598_s2 + $0x50] sm:$0xff] }
   0x3   :  { %v2944_v8 = vpack.c.bf16 %v32_v4, %v29_v2  ;;  %v2946_v9 = vpack.c.bf16 %v39_v6, %v36_v5  ;;  %v35_v10 = vld [vmem:[%s3598_s2 + $0x30] sm:$0xff]  ;;  %v38_v11 = vld [vmem:[%s3598_s2 + $0x48] sm:$0xff]  ;;  %v45_v13 = vld [vmem:[%s3598_s2 + $0x80] sm:$0xff] }
   0x4   :  { %v42_v12 = vld [vmem:[%s3598_s2 + $0x68] sm:$0xff]  ;;  %2290 = vmatprep.subr.bf16.mxu0 %v2931_v3  ;;  %v2962_v14 = vpack.c.bf16 %v38_v11, %v35_v10  ;;  %v41_v16 = vld [vmem:[%s3598_s2 + $0x60] sm:$0xff]  ;;  %v44_v17 = vld [vmem:[%s3598_s2 + $0x78] sm:$0xff] }
   0x5   :  { %2292 = vmatpush1.bf16.msra.mxu0 %v2944_v8  ;;  %v2965_v15 = vpack.c.bf16 %v45_v13, %v42_v12  ;;  %v48_v18 = vld [vmem:[%s3598_s2 + $0x98] sm:$0xff]  ;;  %v51_v19 = vld [vmem:[%s3598_s2 + $0xb0] sm:$0xff]  ;;  %v80_v20 = vld [vmem:[%s3597_s1 + $0x8] sm:$0xff]  ;;  %v2992_v25 = vpack.c.bf16 %v44_v17, %v41_v16 }
   0x6   :  { %2294 = vmatprep.subr.bf16.mxu0 %v2946_v9  ;;  %v83_v21 = vld [vmem:[%s3597_s1 + $0x20] sm:$0xff]  ;;  %v82_v24 = vld [vmem:[%s3597_s1 + $0x18] sm:$0xff]  ;;  %v47_v26 = vld [vmem:[%s3598_s2 + $0x90] sm:$0xff]  ;;  %v2998_v28 = vpack.c.bf16 %v51_v19, %v48_v18 }
   0x7   :  { %v2282_v22 = vpack.c.bf16 %v83_v21, %v80_v20  ;;  %v79_v23 = vld [vmem:[%s3597_s1] sm:$0xff]  ;;  %v50_v29 = vld [vmem:[%s3598_s2 + $0xa8] sm:$0xff]  ;;  %v81_v31 = vld [vmem:[%s3597_s1 + $0x10] sm:$0xff] }
   0x8   :  { %v2284_v27 = vpack.c.bf16 %v82_v24, %v79_v23  ;;  %v54_v30 = vld [vmem:[%s3598_s2 + $0xc8] sm:$0xff]  ;;  %v57_v32 = vld [vmem:[%s3598_s2 + $0xe0] sm:$0xff]  ;;  %v31_v37 = vld [vmem:[%s3598_s2 + $0x10] sm:$0xff]  ;;  %v3023_v38 = vpack.c.bf16 %v50_v29, %v47_v26 }
   0x9   :  { %2296 = vmatpush1.bf16.msra.mxu0 %v2962_v14  ;;  %2283 = vmatprep.subr.bf16.mxu1 %v2282_v22  ;;  %v78_v33 = vld [vmem:[%s3596_s0] sm:$0xff]  ;;  %v84_v34 = vld [vmem:[%s3597_s1 + $0x28] sm:$0xff]  ;;  %v3029_v40 = vpack.c.bf16 %v57_v32, %v54_v30  ;;  %v56_v42 = vld [vmem:[%s3598_s2 + $0xd8] sm:$0xff] }
   0xa   :  { %2298 = vmatprep.subr.bf16.mxu0 %v2965_v15  ;;  %2285 = vmatpush1.bf16.msra.mxu1 %v2284_v27  ;;  %v2287_v36 = vpack.c.bf16 %v84_v34, %v81_v31  ;;  %v34_v39 = vld [vmem:[%s3598_s2 + $0x28] sm:$0xff]  ;;  %v53_v41 = vld [vmem:[%s3598_s2 + $0xc0] sm:$0xff]  ;;  %v60_v43 = vld [vmem:[%s3598_s2 + $0xf8] sm:$0xff] }
   0xb   :  { %2286 = vmatprep.subr.bf16.mxu1 %v2874_v35  ;;  %v63_v44 = vld [vmem:[%s3598_s2 + $0x110] sm:$0xff]  ;;  %v3046_v45 = vpack.c.bf16 %v34_v39, %v31_v37  ;;  %v37_v46 = vld [vmem:[%s3598_s2 + $0x40] sm:$0xff]  ;;  %v40_v47 = vld [vmem:[%s3598_s2 + $0x58] sm:$0xff]  ;;  %v3056_v48 = vpack.c.bf16 %v56_v42, %v53_v41 }
   0xc   :  { %v3059_v49 = vpack.c.bf16 %v63_v44, %v60_v43  ;;  %v59_v50 = vld [vmem:[%s3598_s2 + $0xf0] sm:$0xff]  ;;  %v62_v51 = vld [vmem:[%s3598_s2 + $0x108] sm:$0xff]  ;;  %v69_v53 = vld [vmem:[%s3598_s2 + $0x140] sm:$0xff]  ;;  %v3075_v54 = vpack.c.bf16 %v40_v47, %v37_v46 }
   0xd   :  { %2300 = vmatpush1.bf16.msra.mxu0 %v2992_v25  ;;  %1785 = vmatmul.mubr.msk.f32.vlgmr.msra.gmra.mrb[0].mxu1 %vm102_vm0, %v78_v33  ;;  %v66_v52 = vld [vmem:[%s3598_s2 + $0x128] sm:$0xff] }
   0xe   :  { %2302 = vmatprep.subr.bf16.mxu0 %v2998_v28  ;;  %2288 = vmatpush3.bf16.msra.mxu1 %v2287_v36 }
   0xf   :  { %1964 = vmatprep.mubr.msk.f32.mxu1 %vm2875_vm1, %v2873_v7  ;;  %2321 = vmatprep.subr.bf16.mxu1 %v2874_v35 }
  0x11   :  { %2304 = vmatpush1.bf16.msra.mxu0 %v3023_v38  ;;  %1965 = vmatmul.mubr.msk.f32.vlgmr.msra.gmra.mrb[2].mxu1 %vm102_vm0, %v78_v33 }
  0x12   :  { %2306 = vmatprep.subr.bf16.mxu0 %v3029_v40  ;;  %2323 = vmatpush3.bf16.msra.mxu1 %v3046_v45 }
  0x13   :  { %1999 = vmatprep.mubr.msk.f32.mxu1 %vm2875_vm1, %v2873_v7 }
  0x14   :  { %14 = vsyncpa [#allocation3], 0  ;;  %2324 = vmatprep.subr.bf16.mxu1 %v2874_v35  ;;  %v43_v55 = vld [vmem:[%s3598_s2 + $0x70] sm:$0xff]  ;;  %v46_v56 = vld [vmem:[%s3598_s2 + $0x88] sm:$0xff]  ;;  %v3087_v57 = vpack.c.bf16 %v62_v51, %v59_v50  ;;  %v3090_v58 = vpack.c.bf16 %v69_v53, %v66_v52  ;;  %v87_v31 = vlaneseq  ;;  %vm1647_vm2 = vcmask 1040384  }
  0x15   :  { %2308 = vmatpush1.bf16.msra.mxu0 %v3056_v48  ;;  %v65_v59 = vld [vmem:[%s3598_s2 + $0x120] sm:$0xff]  ;;  %v68_v60 = vld [vmem:[%s3598_s2 + $0x138] sm:$0xff]  ;;  %v75_v62 = vld [vmem:[%s3598_s2 + $0x170] sm:$0xff]  ;;  %v3105_v63 = vpack.c.bf16 %v46_v56, %v43_v55  ;;  %vm1649_vm3 = vcmask 1041408   ;;  %vm1651_vm4 = vcmask 1042432   ;;  %vm1653_vm5 = vcmask 1043456  }
  0x16   :  { %2310 = vmatprep.subr.bf16.mxu0 %v3059_v49  ;;  %v72_v61 = vld [vmem:[%s3598_s2 + $0x158] sm:$0xff]  ;;  %2326 = vmatpush3.bf16.msra.mxu1 %v3075_v54  ;;  %v49_v0 = vld [vmem:[%s3598_s2 + $0xa0] sm:$0xff]  ;;  %v3115_v2 = vpack.c.bf16 %v68_v60, %v65_v59  ;;  %v71_v5 = vld [vmem:[%s3598_s2 + $0x150] sm:$0xff]  ;;  %v88_v33 = vshrl.u32 %v87_v31, 7  ;;  %vm1655_vm6 = vcmask 1044480   ;;  %vm1657_vm7 = vcmask 1045504  }
  0x17   :  { %2327 = vmatprep.subr.bf16.mxu1 %v2874_v35  ;;  %v52_v1 = vld [vmem:[%s3598_s2 + $0xb8] sm:$0xff]  ;;  %v3118_v4 = vpack.c.bf16 %v75_v62, %v72_v61  ;;  %v74_v6 = vld [vmem:[%s3598_s2 + $0x168] sm:$0xff]  ;;  %v55_v11 = vld [vmem:[%s3598_s2 + $0xd0] sm:$0xff]  ;;  %vm1659_vm8 = vcmask 1046528  }
  0x18   :  { %v3127_v10 = vpack.c.bf16 %v52_v1, %v49_v0  ;;  %v58_v12 = vld [vmem:[%s3598_s2 + $0xe8] sm:$0xff]  ;;  %v3137_v13 = vpack.c.bf16 %v74_v6, %v71_v5  ;;  %v61_v17 = vld [vmem:[%s3598_s2 + $0x100] sm:$0xff]  ;;  %v64_v18 = vld [vmem:[%s3598_s2 + $0x118] sm:$0xff]  ;;  %v89_v34 = vsub.s32 0, %v88_v33  ;;  %v93_v37 = vsub.s32 1, %v88_v33 }
  0x19   :  { %2312 = vmatpush1.bf16.msra.mxu0 %v3087_v57  ;;  %v3141_v16 = vpack.c.bf16 %v58_v12, %v55_v11  ;;  %v3153_v19 = vpack.c.bf16 %v64_v18, %v61_v17  ;;  %v67_v20 = vld [vmem:[%s3598_s2 + $0x130] sm:$0xff]  ;;  %v70_v21 = vld [vmem:[%s3598_s2 + $0x148] sm:$0xff]  ;;  %v73_v23 = vld [vmem:[%s3598_s2 + $0x160] sm:$0xff]  ;;  %v97_v60 = vsub.s32 2, %v88_v33 }
  0x1a   :  { %2314 = vmatprep.subr.bf16.mxu0 %v3090_v58  ;;  %2329 = vmatpush3.bf16.msra.mxu1 %v3105_v63  ;;  %v3167_v22 = vpack.c.bf16 %v70_v21, %v67_v20  ;;  %v76_v24 = vld [vmem:[%s3598_s2 + $0x178] sm:$0xff]  ;;  %v85_v36 = vld [vmem:[%s3599_s3] sm:$0x7] }
  0x1b   :  { %2330 = vmatprep.subr.bf16.mxu1 %v2874_v35  ;;  %v3179_v26 = vpack.c.bf16 %v76_v24, %v73_v23  ;;  %v90_v39 = vrot.slane %v85_v36, %v89_v34  ;;  %v94_v41 = vrot.slane %v85_v36, %v93_v37  ;;  %v3227_v62 = vld [vmem:[%s3600_s4] sm:$0x1]  ;;  %v98_v0 = vrot.slane %v85_v36, %v97_v60 }
  0x1d   :  { %2316 = vmatpush1.bf16.msra.mxu0 %v3115_v2 }
  0x1e   :  { %2318 = vmatprep.subr.bf16.mxu0 %v3118_v4  ;;  %2332 = vmatpush3.bf16.msra.mxu1 %v3127_v10 }
  0x1f   :  { %2333 = vmatprep.subr.bf16.mxu1 %v2874_v35 }
  0x21   :  { %2320 = vmatpush1.bf16.msra.mxu0 %v3137_v13 }
  0x22   :  { %2346 = vmatprep.subr.bf16.mxu0 %v2931_v3  ;;  %2335 = vmatpush3.bf16.msra.mxu1 %v3141_v16 }
  0x23   :  { %2336 = vmatprep.subr.bf16.mxu1 %v2874_v35 }
  0x24   :  { %312 = vmatmul.mubr.f32.vlgmr.msra.gmra.mrb[0].mxu0 %v2873_v7 }
  0x25   :  { %2348 = vmatpush1.bf16.msra.mxu0 %v2944_v8  ;;  %474 = vmatprep.mubr.f32.mxu0 %v2873_v7 }
  0x26   :  { %2350 = vmatprep.subr.bf16.mxu0 %v2946_v9  ;;  %2338 = vmatpush3.bf16.msra.mxu1 %v3153_v19 }
  0x27   :  { %2339 = vmatprep.subr.bf16.mxu1 %v2874_v35 }
  0x29   :  { %2352 = vmatpush1.bf16.msra.mxu0 %v2962_v14 }
  0x2a   :  { %2354 = vmatprep.subr.bf16.mxu0 %v2965_v15  ;;  %2341 = vmatpush3.bf16.msra.mxu1 %v3167_v22 }
  0x2b   :  { %2342 = vmatprep.subr.bf16.mxu1 %v2874_v35 }
  0x2d   :  { %2356 = vmatpush1.bf16.msra.mxu0 %v2992_v25 }
  0x2e   :  { %2358 = vmatprep.subr.bf16.mxu0 %v2998_v28  ;;  %2344 = vmatpush3.bf16.msra.mxu1 %v3179_v26 }
  0x2f   :  { %2377 = vmatprep.subr.bf16.mxu1 %v2874_v35 }
  0x31   :  { %2360 = vmatpush1.bf16.msra.mxu0 %v3023_v38  ;;  %2000 = vmatmul.mubr.f32.vlgmr.msra.gmra.mrb[4].mxu1 %v2873_v7 }
  0x32   :  { %2362 = vmatprep.subr.bf16.mxu0 %v3029_v40  ;;  %2379 = vmatpush3.bf16.msra.mxu1 %v3046_v45 }
  0x33   :  { %2034 = vmatprep.mubr.msk.f32.mxu1 %vm2875_vm1, %v2873_v7  ;;  %2380 = vmatprep.subr.bf16.mxu1 %v2874_v35 }
  0x35   :  { %2364 = vmatpush1.bf16.msra.mxu0 %v3056_v48 }
  0x36   :  { %2366 = vmatprep.subr.bf16.mxu0 %v3059_v49  ;;  %2382 = vmatpush3.bf16.msra.mxu1 %v3075_v54 }
  0x37   :  { %2383 = vmatprep.subr.bf16.mxu1 %v2874_v35 }
  0x39   :  { %2368 = vmatpush1.bf16.msra.mxu0 %v3087_v57 }
  0x3a   :  { %2370 = vmatprep.subr.bf16.mxu0 %v3090_v58  ;;  %2385 = vmatpush3.bf16.msra.mxu1 %v3105_v63 }
  0x3b   :  { %2386 = vmatprep.subr.bf16.mxu1 %v2874_v35 }
  0x3d   :  { %2372 = vmatpush1.bf16.msra.mxu0 %v3115_v2 }
  0x3e   :  { %2374 = vmatprep.subr.bf16.mxu0 %v3118_v4  ;;  %2388 = vmatpush3.bf16.msra.mxu1 %v3127_v10 }
  0x3f   :  { %2389 = vmatprep.subr.bf16.mxu1 %v2874_v35 }
  0x41   :  { %2376 = vmatpush1.bf16.msra.mxu0 %v3137_v13 }
  0x42   :  { %2402 = vmatprep.subr.bf16.mxu0 %v2931_v3  ;;  %2391 = vmatpush3.bf16.msra.mxu1 %v3141_v16 }
  0x43   :  { %2392 = vmatprep.subr.bf16.mxu1 %v2874_v35 }
  0x46   :  { %2394 = vmatpush3.bf16.msra.mxu1 %v3153_v19 }
  0x47   :  { %2395 = vmatprep.subr.bf16.mxu1 %v2874_v35 }
  0x4a   :  { %2397 = vmatpush3.bf16.msra.mxu1 %v3167_v22 }
  0x4b   :  { %2398 = vmatprep.subr.bf16.mxu1 %v2874_v35 }
  0x4e   :  { %2400 = vmatpush3.bf16.msra.mxu1 %v3179_v26 }
  0x4f   :  { %2433 = vmatprep.subr.bf16.mxu1 %v2874_v35 }
  0xe0   :  { %v172_v27 = vpop.f32.mrb[0].mxu1 }
  0xe1   :  { %v174_v29 = vpop.f32.mrb[1].mxu1  ;;  %v3218_v42 = vadd.f32 %v172_v27, %v90_v39 }
  0xe2   :  { %v3221_v47 = vadd.f32 %v174_v29, %v94_v41 }
  0xe4   :  { %v243_v30 = vpop.f32.mrb[2].mxu1 }
  0xe5   :  { %v1966_v32 = vpop.f32.mrb[3].mxu1  ;;  %v3230_v11 = vadd.f32 %v243_v30, %v98_v0 }
  0xf7   :  { %v313_v43 = vpop.f32.mrb[0].mxu0 }
  0xf8   :  { %v388_v44 = vadd.f32 %v313_v43, %v3218_v42  ;;  %v315_v46 = vpop.f32.mrb[1].mxu0 }
  0xf9   :  { %v389_v51 = vadd.f32 %v315_v46, %v3221_v47 }
  0xfa   :  { %v1787_v50 = vmul.f32 -1.442695, %v388_v44 }
  0xfb   :  { %v1788_v52 = vmul.f32 -1.442695, %v389_v51 }
  0xfc   :  { %2765 = vpow2.f32 %v1787_v50 }
  0xfd   :  { %2767 = vpow2.f32 %v1788_v52 }
 0x104   :  { %v384_v53 = vpop.f32.mrb[4].mxu1 }
 0x105   :  { %v2001_v56 = vpop.f32.mrb[5].mxu1  ;;  %v402_v5 = vadd.f32 %v384_v53, %v3227_v62 }
 0x106   :  { %v2766_v55 = vpop.eup %2765 }
 0x107   :  { %v396_v59 = vadd.f32 1.0, %v2766_v55  ;;  %v2768_v61 = vpop.eup %2767 }
 0x108   :  { %v397_v1 = vadd.f32 1.0, %v2768_v61 }
 0x109   :  { %2769 = vrcp.f32 %v396_v59 }
 0x10a   :  { %2771 = vrcp.f32 %v397_v1 }
 0x113   :  { %v2770_v6 = vpop.eup %2769 }
 0x114   :  { %v403_v12 = vmul.f32 %v2770_v6, %v402_v5  ;;  %v2772_v18 = vpop.eup %2771 }
 0x115   :  { %v406_v20 = vsub.f32 1.0, %v2772_v18  ;;  %v408_v24 = vmul.f32 0.0, %v2772_v18 }
 0x116   :  { %v404_v17 = vadd.f32 %v403_v12, %v3230_v11 }
 0x118   :  { %2773 = vtanh.f32 %v404_v17 }
 0x122   :  { %v2774_v21 = vpop.eup %2773 }
 0x123   :  { %v407_v23 = vmul.f32 %v2774_v21, %v406_v20 }
 0x125   :  { %v3233_v27 = vadd.f32 %v408_v24, %v407_v23 }
 0x127   :  { %475 = vmatmul.mubr.f32.vlgmr.msra.gmra.mrb[2].mxu0 %v3233_v27  ;;  %2035 = vmatmul.mubr.f32.vlgmr.msra.gmra.mrb[6].mxu1 %v3233_v27  ;;  %v581_v60 = vrot.slane %v3233_v27, 7 }
 0x128   :  { %2404 = vmatpush1.bf16.msra.mxu0 %v2944_v8  ;;  %2435 = vmatpush3.bf16.msra.mxu1 %v3046_v45 }
 0x129   :  { %2406 = vmatprep.subr.bf16.mxu0 %v2946_v9  ;;  %2436 = vmatprep.subr.bf16.mxu1 %v2874_v35 }
 0x12a   :  { %652 = vmatprep.mubr.f32.mxu0 %v2873_v7  ;;  %2069 = vmatprep.mubr.msk.f32.mxu1 %vm2875_vm1, %v2873_v7 }
 0x12c   :  { %2408 = vmatpush1.bf16.msra.mxu0 %v2962_v14  ;;  %2438 = vmatpush3.bf16.msra.mxu1 %v3075_v54 }
 0x12d   :  { %2410 = vmatprep.subr.bf16.mxu0 %v2965_v15  ;;  %2439 = vmatprep.subr.bf16.mxu1 %v2874_v35 }
 0x130   :  { %2412 = vmatpush1.bf16.msra.mxu0 %v2992_v25  ;;  %2441 = vmatpush3.bf16.msra.mxu1 %v3105_v63 }
 0x131   :  { %2414 = vmatprep.subr.bf16.mxu0 %v2998_v28  ;;  %2442 = vmatprep.subr.bf16.mxu1 %v2874_v35 }
 0x134   :  { %2416 = vmatpush1.bf16.msra.mxu0 %v3023_v38  ;;  %2444 = vmatpush3.bf16.msra.mxu1 %v3127_v10 }
 0x135   :  { %2418 = vmatprep.subr.bf16.mxu0 %v3029_v40  ;;  %2445 = vmatprep.subr.bf16.mxu1 %v2874_v35 }
 0x138   :  { %2420 = vmatpush1.bf16.msra.mxu0 %v3056_v48  ;;  %2447 = vmatpush3.bf16.msra.mxu1 %v3141_v16 }
 0x139   :  { %2422 = vmatprep.subr.bf16.mxu0 %v3059_v49  ;;  %2448 = vmatprep.subr.bf16.mxu1 %v2874_v35 }
 0x13c   :  { %2424 = vmatpush1.bf16.msra.mxu0 %v3087_v57  ;;  %2450 = vmatpush3.bf16.msra.mxu1 %v3153_v19 }
 0x13d   :  { %2426 = vmatprep.subr.bf16.mxu0 %v3090_v58  ;;  %2451 = vmatprep.subr.bf16.mxu1 %v2874_v35 }
 0x140   :  { %2428 = vmatpush1.bf16.msra.mxu0 %v3115_v2  ;;  %2453 = vmatpush3.bf16.msra.mxu1 %v3167_v22 }
 0x141   :  { %2430 = vmatprep.subr.bf16.mxu0 %v3118_v4  ;;  %2454 = vmatprep.subr.bf16.mxu1 %v2874_v35 }
 0x144   :  { %2432 = vmatpush1.bf16.msra.mxu0 %v3137_v13  ;;  %2456 = vmatpush3.bf16.msra.mxu1 %v3179_v26 }
 0x145   :  { %2458 = vmatprep.subr.bf16.mxu0 %v2931_v3  ;;  %2489 = vmatprep.subr.bf16.mxu1 %v2874_v35 }
 0x1fa   :  { %v476_v29 = vpop.f32.mrb[2].mxu0  ;;  %v547_v30 = vpop.f32.mrb[6].mxu1 }
 0x1fb   :  { %v553_v31 = vrot.slane %v476_v29, 7  ;;  %v478_v32 = vpop.f32.mrb[3].mxu0  ;;  %v2036_v33 = vpop.f32.mrb[7].mxu1  ;;  %v571_v50 = vadd.f32 %v547_v30, %v3227_v62 }
 0x1fc   :  { %v554_v34 = vrot.slane %v478_v32, 7 }
 0x1fd   :  { %v557_v36 = vadd.f32 %v553_v31, %v3218_v42  ;;  %v573_v52 = vrot.slane %v571_v50, 7 }
 0x1fe   :  { %v558_v39 = vadd.f32 %v554_v34, %v3221_v47 }
 0x1ff   :  { %v1789_v37 = vmul.f32 -1.442695, %v557_v36 }
 0x200   :  { %v1790_v41 = vmul.f32 -1.442695, %v558_v39 }
 0x201   :  { %2775 = vpow2.f32 %v1789_v37 }
 0x202   :  { %2777 = vpow2.f32 %v1790_v41 }
 0x20b   :  { %v2776_v43 = vpop.eup %2775 }
 0x20c   :  { %v565_v44 = vadd.f32 1.0, %v2776_v43  ;;  %v2778_v46 = vpop.eup %2777 }
 0x20d   :  { %v566_v51 = vadd.f32 1.0, %v2778_v46 }
 0x20e   :  { %2779 = vrcp.f32 %v565_v44 }
 0x20f   :  { %2781 = vrcp.f32 %v566_v51 }
 0x218   :  { %v2780_v53 = vpop.eup %2779 }
 0x219   :  { %v575_v55 = vmul.f32 %v2780_v53, %v573_v52  ;;  %v2782_v59 = vpop.eup %2781 }
 0x21a   :  { %v578_v61 = vsub.f32 1.0, %v2782_v59  ;;  %v583_v5 = vmul.f32 %v2782_v59, %v581_v60 }
 0x21b   :  { %v576_v56 = vadd.f32 %v575_v55, %v3230_v11 }
 0x21d   :  { %2783 = vtanh.f32 %v576_v56 }
 0x227   :  { %v2784_v0 = vpop.eup %2783 }
 0x228   :  { %v579_v1 = vmul.f32 %v2784_v0, %v578_v61 }
 0x22a   :  { %v3277_v6 = vadd.f32 %v583_v5, %v579_v1 }
 0x22c   :  { %v586_v12 = vrot.slane %v3277_v6, 1  ;;  %v758_v44 = vrot.slane %v3277_v6, 7  ;;  %v1648_v60 = vsel %vm1647_vm2, %v3233_v27, %v3277_v6 }
 0x22e   :  { %653 = vmatmul.mubr.f32.vlgmr.msra.gmra.mrb[4].mxu0 %v586_v12  ;;  %2070 = vmatmul.mubr.f32.vlgmr.msra.gmra.mrb[8].mxu1 %v586_v12 }
 0x22f   :  { %2460 = vmatpush1.bf16.msra.mxu0 %v2944_v8  ;;  %2491 = vmatpush3.bf16.msra.mxu1 %v3046_v45 }
 0x230   :  { %2462 = vmatprep.subr.bf16.mxu0 %v2946_v9  ;;  %2492 = vmatprep.subr.bf16.mxu1 %v2874_v35 }
 0x231   :  { %829 = vmatprep.mubr.f32.mxu0 %v2873_v7  ;;  %2104 = vmatprep.mubr.msk.f32.mxu1 %vm2875_vm1, %v2873_v7 }
 0x233   :  { %2464 = vmatpush1.bf16.msra.mxu0 %v2962_v14  ;;  %2494 = vmatpush3.bf16.msra.mxu1 %v3075_v54 }
 0x234   :  { %2466 = vmatprep.subr.bf16.mxu0 %v2965_v15  ;;  %2495 = vmatprep.subr.bf16.mxu1 %v2874_v35 }
 0x237   :  { %2468 = vmatpush1.bf16.msra.mxu0 %v2992_v25  ;;  %2497 = vmatpush3.bf16.msra.mxu1 %v3105_v63 }
 0x238   :  { %2470 = vmatprep.subr.bf16.mxu0 %v2998_v28  ;;  %2498 = vmatprep.subr.bf16.mxu1 %v2874_v35 }
 0x23b   :  { %2472 = vmatpush1.bf16.msra.mxu0 %v3023_v38  ;;  %2500 = vmatpush3.bf16.msra.mxu1 %v3127_v10 }
 0x23c   :  { %2474 = vmatprep.subr.bf16.mxu0 %v3029_v40  ;;  %2501 = vmatprep.subr.bf16.mxu1 %v2874_v35 }
 0x23f   :  { %2476 = vmatpush1.bf16.msra.mxu0 %v3056_v48  ;;  %2503 = vmatpush3.bf16.msra.mxu1 %v3141_v16 }
 0x240   :  { %2478 = vmatprep.subr.bf16.mxu0 %v3059_v49  ;;  %2504 = vmatprep.subr.bf16.mxu1 %v2874_v35 }
 0x243   :  { %2480 = vmatpush1.bf16.msra.mxu0 %v3087_v57  ;;  %2506 = vmatpush3.bf16.msra.mxu1 %v3153_v19 }
 0x244   :  { %2482 = vmatprep.subr.bf16.mxu0 %v3090_v58  ;;  %2507 = vmatprep.subr.bf16.mxu1 %v2874_v35 }
 0x247   :  { %2484 = vmatpush1.bf16.msra.mxu0 %v3115_v2  ;;  %2509 = vmatpush3.bf16.msra.mxu1 %v3167_v22 }
 0x248   :  { %2486 = vmatprep.subr.bf16.mxu0 %v3118_v4  ;;  %2510 = vmatprep.subr.bf16.mxu1 %v2874_v35 }
 0x24b   :  { %2488 = vmatpush1.bf16.msra.mxu0 %v3137_v13  ;;  %2512 = vmatpush3.bf16.msra.mxu1 %v3179_v26 }
 0x24c   :  { %2514 = vmatprep.subr.bf16.mxu0 %v2931_v3  ;;  %2545 = vmatprep.subr.bf16.mxu1 %v2874_v35 }
 0x301   :  { %v654_v17 = vpop.f32.mrb[4].mxu0  ;;  %v725_v18 = vpop.f32.mrb[8].mxu1 }
 0x302   :  { %v731_v20 = vrot.slane %v654_v17, 6  ;;  %v656_v21 = vpop.f32.mrb[5].mxu0  ;;  %v2071_v23 = vpop.f32.mrb[9].mxu1  ;;  %v749_v39 = vadd.f32 %v725_v18, %v3227_v62 }
 0x303   :  { %v732_v24 = vrot.slane %v656_v21, 6 }
 0x304   :  { %v735_v29 = vadd.f32 %v731_v20, %v3218_v42  ;;  %v751_v41 = vrot.slane %v749_v39, 6 }
 0x305   :  { %v736_v30 = vadd.f32 %v732_v24, %v3221_v47 }
 0x306   :  { %v1791_v31 = vmul.f32 -1.442695, %v735_v29 }
 0x307   :  { %v1792_v32 = vmul.f32 -1.442695, %v736_v30 }
 0x308   :  { %2785 = vpow2.f32 %v1791_v31 }
 0x309   :  { %2787 = vpow2.f32 %v1792_v32 }
 0x312   :  { %v2786_v33 = vpop.eup %2785 }
 0x313   :  { %v2788_v34 = vpop.eup %2787  ;;  %v743_v36 = vadd.f32 1.0, %v2786_v33 }
 0x314   :  { %v744_v37 = vadd.f32 1.0, %v2788_v34 }
 0x315   :  { %2789 = vrcp.f32 %v743_v36 }
 0x316   :  { %2791 = vrcp.f32 %v744_v37 }
 0x31f   :  { %v2790_v43 = vpop.eup %2789 }
 0x320   :  { %v2792_v46 = vpop.eup %2791  ;;  %v753_v50 = vmul.f32 %v2790_v43, %v751_v41 }
 0x321   :  { %v760_v51 = vmul.f32 %v2792_v46, %v758_v44  ;;  %v756_v53 = vsub.f32 1.0, %v2792_v46 }
 0x322   :  { %v754_v52 = vadd.f32 %v753_v50, %v3230_v11 }
 0x324   :  { %2793 = vtanh.f32 %v754_v52 }
 0x32e   :  { %v2794_v55 = vpop.eup %2793 }
 0x32f   :  { %v757_v56 = vmul.f32 %v2794_v55, %v756_v53 }
 0x331   :  { %v3320_v59 = vadd.f32 %v760_v51, %v757_v56 }
 0x333   :  { %v763_v61 = vrot.slane %v3320_v59, 2  ;;  %v3326_v0 = vsel %vm1649_vm3, %v1648_v60, %v3320_v59  ;;  %v935_v36 = vrot.slane %v3320_v59, 7 }
 0x335   :  { %830 = vmatmul.mubr.f32.vlgmr.msra.gmra.mrb[6].mxu0 %v763_v61  ;;  %2105 = vmatmul.mubr.f32.vlgmr.msra.gmra.mrb[10].mxu1 %v763_v61 }
 0x336   :  { %2516 = vmatpush1.bf16.msra.mxu0 %v2944_v8  ;;  %2547 = vmatpush3.bf16.msra.mxu1 %v3046_v45 }
 0x337   :  { %2518 = vmatprep.subr.bf16.mxu0 %v2946_v9  ;;  %2548 = vmatprep.subr.bf16.mxu1 %v2874_v35 }
 0x338   :  { %1006 = vmatprep.mubr.f32.mxu0 %v2873_v7  ;;  %2139 = vmatprep.mubr.msk.f32.mxu1 %vm2875_vm1, %v2873_v7 }
 0x33a   :  { %2520 = vmatpush1.bf16.msra.mxu0 %v2962_v14  ;;  %2550 = vmatpush3.bf16.msra.mxu1 %v3075_v54 }
 0x33b   :  { %2522 = vmatprep.subr.bf16.mxu0 %v2965_v15  ;;  %2551 = vmatprep.subr.bf16.mxu1 %v2874_v35 }
 0x33e   :  { %2524 = vmatpush1.bf16.msra.mxu0 %v2992_v25  ;;  %2553 = vmatpush3.bf16.msra.mxu1 %v3105_v63 }
 0x33f   :  { %2526 = vmatprep.subr.bf16.mxu0 %v2998_v28  ;;  %2554 = vmatprep.subr.bf16.mxu1 %v2874_v35 }
 0x342   :  { %2528 = vmatpush1.bf16.msra.mxu0 %v3023_v38  ;;  %2556 = vmatpush3.bf16.msra.mxu1 %v3127_v10 }
 0x343   :  { %2530 = vmatprep.subr.bf16.mxu0 %v3029_v40  ;;  %2557 = vmatprep.subr.bf16.mxu1 %v2874_v35 }
 0x346   :  { %2532 = vmatpush1.bf16.msra.mxu0 %v3056_v48  ;;  %2559 = vmatpush3.bf16.msra.mxu1 %v3141_v16 }
 0x347   :  { %2534 = vmatprep.subr.bf16.mxu0 %v3059_v49  ;;  %2560 = vmatprep.subr.bf16.mxu1 %v2874_v35 }
 0x34a   :  { %2536 = vmatpush1.bf16.msra.mxu0 %v3087_v57  ;;  %2562 = vmatpush3.bf16.msra.mxu1 %v3153_v19 }
 0x34b   :  { %2538 = vmatprep.subr.bf16.mxu0 %v3090_v58  ;;  %2563 = vmatprep.subr.bf16.mxu1 %v2874_v35 }
 0x34e   :  { %2540 = vmatpush1.bf16.msra.mxu0 %v3115_v2  ;;  %2565 = vmatpush3.bf16.msra.mxu1 %v3167_v22 }
 0x34f   :  { %2542 = vmatprep.subr.bf16.mxu0 %v3118_v4  ;;  %2566 = vmatprep.subr.bf16.mxu1 %v2874_v35 }
 0x352   :  { %2544 = vmatpush1.bf16.msra.mxu0 %v3137_v13  ;;  %2568 = vmatpush3.bf16.msra.mxu1 %v3179_v26 }
 0x353   :  { %2570 = vmatprep.subr.bf16.mxu0 %v2931_v3  ;;  %2601 = vmatprep.subr.bf16.mxu1 %v2874_v35 }
 0x408   :  { %v831_v27 = vpop.f32.mrb[6].mxu0  ;;  %v902_v1 = vpop.f32.mrb[10].mxu1 }
 0x409   :  { %v908_v5 = vrot.slane %v831_v27, 5  ;;  %v833_v6 = vpop.f32.mrb[7].mxu0  ;;  %v2106_v12 = vpop.f32.mrb[11].mxu1  ;;  %v926_v32 = vadd.f32 %v902_v1, %v3227_v62 }
 0x40a   :  { %v909_v17 = vrot.slane %v833_v6, 5 }
 0x40b   :  { %v912_v18 = vadd.f32 %v908_v5, %v3218_v42  ;;  %v928_v33 = vrot.slane %v926_v32, 5 }
 0x40c   :  { %v913_v20 = vadd.f32 %v909_v17, %v3221_v47 }
 0x40d   :  { %v1793_v21 = vmul.f32 -1.442695, %v912_v18 }
 0x40e   :  { %v1794_v23 = vmul.f32 -1.442695, %v913_v20 }
 0x40f   :  { %2795 = vpow2.f32 %v1793_v21 }
 0x410   :  { %2797 = vpow2.f32 %v1794_v23 }
 0x419   :  { %v2796_v24 = vpop.eup %2795 }
 0x41a   :  { %v2798_v29 = vpop.eup %2797  ;;  %v920_v30 = vadd.f32 1.0, %v2796_v24 }
 0x41b   :  { %v921_v31 = vadd.f32 1.0, %v2798_v29 }
 0x41c   :  { %2799 = vrcp.f32 %v920_v30 }
 0x41d   :  { %2801 = vrcp.f32 %v921_v31 }
 0x426   :  { %v2800_v34 = vpop.eup %2799 }
 0x427   :  { %v2802_v37 = vpop.eup %2801  ;;  %v930_v39 = vmul.f32 %v2800_v34, %v928_v33 }
 0x428   :  { %v937_v41 = vmul.f32 %v2802_v37, %v935_v36  ;;  %v933_v44 = vsub.f32 1.0, %v2802_v37 }
 0x429   :  { %v931_v43 = vadd.f32 %v930_v39, %v3230_v11 }
 0x42b   :  { %2803 = vtanh.f32 %v931_v43 }
 0x435   :  { %v2804_v46 = vpop.eup %2803 }
 0x436   :  { %v934_v50 = vmul.f32 %v2804_v46, %v933_v44 }
 0x438   :  { %v3368_v51 = vadd.f32 %v937_v41, %v934_v50 }
 0x43a   :  { %v940_v52 = vrot.slane %v3368_v51, 3  ;;  %v3373_v53 = vsel %vm1651_vm4, %v3326_v0, %v3368_v51  ;;  %v1112_v29 = vrot.slane %v3368_v51, 7 }
 0x43c   :  { %1007 = vmatmul.mubr.f32.vlgmr.msra.gmra.mrb[8].mxu0 %v940_v52  ;;  %2140 = vmatmul.mubr.f32.vlgmr.msra.gmra.mrb[12].mxu1 %v940_v52 }
 0x43d   :  { %2572 = vmatpush1.bf16.msra.mxu0 %v2944_v8  ;;  %2603 = vmatpush3.bf16.msra.mxu1 %v3046_v45 }
 0x43e   :  { %2574 = vmatprep.subr.bf16.mxu0 %v2946_v9  ;;  %2604 = vmatprep.subr.bf16.mxu1 %v2874_v35 }
 0x43f   :  { %1183 = vmatprep.mubr.f32.mxu0 %v2873_v7  ;;  %2174 = vmatprep.mubr.msk.f32.mxu1 %vm2875_vm1, %v2873_v7 }
 0x441   :  { %2576 = vmatpush1.bf16.msra.mxu0 %v2962_v14  ;;  %2606 = vmatpush3.bf16.msra.mxu1 %v3075_v54 }
 0x442   :  { %2578 = vmatprep.subr.bf16.mxu0 %v2965_v15  ;;  %2607 = vmatprep.subr.bf16.mxu1 %v2874_v35 }
 0x445   :  { %2580 = vmatpush1.bf16.msra.mxu0 %v2992_v25  ;;  %2609 = vmatpush3.bf16.msra.mxu1 %v3105_v63 }
 0x446   :  { %2582 = vmatprep.subr.bf16.mxu0 %v2998_v28  ;;  %2610 = vmatprep.subr.bf16.mxu1 %v2874_v35 }
 0x449   :  { %2584 = vmatpush1.bf16.msra.mxu0 %v3023_v38  ;;  %2612 = vmatpush3.bf16.msra.mxu1 %v3127_v10 }
 0x44a   :  { %2586 = vmatprep.subr.bf16.mxu0 %v3029_v40  ;;  %2613 = vmatprep.subr.bf16.mxu1 %v2874_v35 }
 0x44d   :  { %2588 = vmatpush1.bf16.msra.mxu0 %v3056_v48  ;;  %2615 = vmatpush3.bf16.msra.mxu1 %v3141_v16 }
 0x44e   :  { %2590 = vmatprep.subr.bf16.mxu0 %v3059_v49  ;;  %2616 = vmatprep.subr.bf16.mxu1 %v2874_v35 }
 0x451   :  { %2592 = vmatpush1.bf16.msra.mxu0 %v3087_v57  ;;  %2618 = vmatpush3.bf16.msra.mxu1 %v3153_v19 }
 0x452   :  { %2594 = vmatprep.subr.bf16.mxu0 %v3090_v58  ;;  %2619 = vmatprep.subr.bf16.mxu1 %v2874_v35 }
 0x455   :  { %2596 = vmatpush1.bf16.msra.mxu0 %v3115_v2  ;;  %2621 = vmatpush3.bf16.msra.mxu1 %v3167_v22 }
 0x456   :  { %2598 = vmatprep.subr.bf16.mxu0 %v3118_v4  ;;  %2622 = vmatprep.subr.bf16.mxu1 %v2874_v35 }
 0x459   :  { %2600 = vmatpush1.bf16.msra.mxu0 %v3137_v13  ;;  %2624 = vmatpush3.bf16.msra.mxu1 %v3179_v26 }
 0x45a   :  { %2626 = vmatprep.subr.bf16.mxu0 %v2931_v3  ;;  %2657 = vmatprep.subr.bf16.mxu1 %v2874_v35 }
 0x50f   :  { %v1008_v55 = vpop.f32.mrb[8].mxu0  ;;  %v1079_v56 = vpop.f32.mrb[12].mxu1 }
 0x510   :  { %v1085_v59 = vrot.slane %v1008_v55, 4  ;;  %v1010_v60 = vpop.f32.mrb[9].mxu0  ;;  %v2141_v61 = vpop.f32.mrb[13].mxu1  ;;  %v1103_v21 = vadd.f32 %v1079_v56, %v3227_v62 }
 0x511   :  { %v1086_v0 = vrot.slane %v1010_v60, 4 }
 0x512   :  { %v1089_v27 = vadd.f32 %v1085_v59, %v3218_v42  ;;  %v1105_v23 = vrot.slane %v1103_v21, 4 }
 0x513   :  { %v1090_v1 = vadd.f32 %v1086_v0, %v3221_v47 }
 0x514   :  { %v1795_v5 = vmul.f32 -1.442695, %v1089_v27 }
 0x515   :  { %v1796_v6 = vmul.f32 -1.442695, %v1090_v1 }
 0x516   :  { %2805 = vpow2.f32 %v1795_v5 }
 0x517   :  { %2807 = vpow2.f32 %v1796_v6 }
 0x520   :  { %v2806_v12 = vpop.eup %2805 }
 0x521   :  { %v2808_v17 = vpop.eup %2807  ;;  %v1097_v18 = vadd.f32 1.0, %v2806_v12 }
 0x522   :  { %v1098_v20 = vadd.f32 1.0, %v2808_v17 }
 0x523   :  { %2809 = vrcp.f32 %v1097_v18 }
 0x524   :  { %2811 = vrcp.f32 %v1098_v20 }
 0x52d   :  { %v2810_v24 = vpop.eup %2809 }
 0x52e   :  { %v2812_v30 = vpop.eup %2811  ;;  %v1107_v31 = vmul.f32 %v2810_v24, %v1105_v23 }
 0x52f   :  { %v1114_v32 = vmul.f32 %v2812_v30, %v1112_v29  ;;  %v1110_v34 = vsub.f32 1.0, %v2812_v30 }
 0x530   :  { %v1108_v33 = vadd.f32 %v1107_v31, %v3230_v11 }
 0x532   :  { %2813 = vtanh.f32 %v1108_v33 }
 0x53c   :  { %v2814_v36 = vpop.eup %2813 }
 0x53d   :  { %v1111_v37 = vmul.f32 %v2814_v36, %v1110_v34 }
 0x53f   :  { %v3415_v39 = vadd.f32 %v1114_v32, %v1111_v37 }
 0x541   :  { %v1117_v41 = vrot.slane %v3415_v39, 4  ;;  %v3420_v43 = vsel %vm1653_vm5, %v3373_v53, %v3415_v39  ;;  %v1289_v12 = vrot.slane %v3415_v39, 7 }
 0x543   :  { %1184 = vmatmul.mubr.f32.vlgmr.msra.gmra.mrb[10].mxu0 %v1117_v41  ;;  %2175 = vmatmul.mubr.f32.vlgmr.msra.gmra.mrb[14].mxu1 %v1117_v41  ;;  %v1662_v41 = vld [vmem:[%s3601_s5] sm:$0xff] }
 0x544   :  { %2628 = vmatpush1.bf16.msra.mxu0 %v2944_v8  ;;  %2659 = vmatpush3.bf16.msra.mxu1 %v3046_v45 }
 0x545   :  { %2630 = vmatprep.subr.bf16.mxu0 %v2946_v9  ;;  %2660 = vmatprep.subr.bf16.mxu1 %v2874_v35 }
 0x546   :  { %1360 = vmatprep.mubr.f32.mxu0 %v2873_v7  ;;  %2209 = vmatprep.mubr.msk.f32.mxu1 %vm2875_vm1, %v2873_v7 }
 0x548   :  { %2632 = vmatpush1.bf16.msra.mxu0 %v2962_v14  ;;  %2662 = vmatpush3.bf16.msra.mxu1 %v3075_v54 }
 0x549   :  { %2634 = vmatprep.subr.bf16.mxu0 %v2965_v15  ;;  %2663 = vmatprep.subr.bf16.mxu1 %v2874_v35 }
 0x54c   :  { %2636 = vmatpush1.bf16.msra.mxu0 %v2992_v25  ;;  %2665 = vmatpush3.bf16.msra.mxu1 %v3105_v63 }
 0x54d   :  { %2638 = vmatprep.subr.bf16.mxu0 %v2998_v28  ;;  %2666 = vmatprep.subr.bf16.mxu1 %v2874_v35 }
 0x550   :  { %2640 = vmatpush1.bf16.msra.mxu0 %v3023_v38  ;;  %2668 = vmatpush3.bf16.msra.mxu1 %v3127_v10 }
 0x551   :  { %2642 = vmatprep.subr.bf16.mxu0 %v3029_v40  ;;  %2669 = vmatprep.subr.bf16.mxu1 %v2874_v35 }
 0x554   :  { %2644 = vmatpush1.bf16.msra.mxu0 %v3056_v48  ;;  %2671 = vmatpush3.bf16.msra.mxu1 %v3141_v16 }
 0x555   :  { %2646 = vmatprep.subr.bf16.mxu0 %v3059_v49  ;;  %2672 = vmatprep.subr.bf16.mxu1 %v2874_v35 }
 0x558   :  { %2648 = vmatpush1.bf16.msra.mxu0 %v3087_v57  ;;  %2674 = vmatpush3.bf16.msra.mxu1 %v3153_v19 }
 0x559   :  { %2650 = vmatprep.subr.bf16.mxu0 %v3090_v58  ;;  %2675 = vmatprep.subr.bf16.mxu1 %v2874_v35 }
 0x55c   :  { %2652 = vmatpush1.bf16.msra.mxu0 %v3115_v2  ;;  %2677 = vmatpush3.bf16.msra.mxu1 %v3167_v22 }
 0x55d   :  { %2654 = vmatprep.subr.bf16.mxu0 %v3118_v4  ;;  %2678 = vmatprep.subr.bf16.mxu1 %v2874_v35 }
 0x560   :  { %2656 = vmatpush1.bf16.msra.mxu0 %v3137_v13  ;;  %2680 = vmatpush3.bf16.msra.mxu1 %v3179_v26 }
 0x561   :  { %2682 = vmatprep.subr.bf16.mxu0 %v2931_v3  ;;  %2713 = vmatprep.subr.bf16.mxu1 %v2874_v35 }
 0x616   :  { %v1185_v44 = vpop.f32.mrb[10].mxu0  ;;  %v1256_v46 = vpop.f32.mrb[14].mxu1 }
 0x617   :  { %v1262_v50 = vrot.slane %v1185_v44, 3  ;;  %v1187_v51 = vpop.f32.mrb[11].mxu0  ;;  %v2176_v52 = vpop.f32.mrb[15].mxu1  ;;  %v1280_v1 = vadd.f32 %v1256_v46, %v3227_v62  ;;  %v1664_v46 = vld [vmem:[%s3601_s5 + $0x10] sm:$0xff] }
 0x618   :  { %v1263_v53 = vrot.slane %v1187_v51, 3  ;;  %v1666_v51 = vld [vmem:[%s3601_s5 + $0x20] sm:$0xff]  ;;  %v1667_v52 = vld [vmem:[%s3601_s5 + $0x28] sm:$0xff] }
 0x619   :  { %v1266_v55 = vadd.f32 %v1262_v50, %v3218_v42  ;;  %v1282_v5 = vrot.slane %v1280_v1, 3 }
 0x61a   :  { %v1267_v56 = vadd.f32 %v1263_v53, %v3221_v47  ;;  %v2744_v53 = vpack.c.bf16 %v1667_v52, %v1666_v51 }
 0x61b   :  { %v1797_v59 = vmul.f32 -1.442695, %v1266_v55  ;;  %v1668_v55 = vld [vmem:[%s3601_s5 + $0x30] sm:$0xff] }
 0x61c   :  { %v1798_v60 = vmul.f32 -1.442695, %v1267_v56  ;;  %v1669_v56 = vld [vmem:[%s3601_s5 + $0x38] sm:$0xff] }
 0x61d   :  { %2815 = vpow2.f32 %v1797_v59  ;;  %v2747_v59 = vpack.c.bf16 %v1669_v56, %v1668_v55 }
 0x61e   :  { %2817 = vpow2.f32 %v1798_v60  ;;  %v1670_v60 = vld [vmem:[%s3601_s5 + $0x40] sm:$0xff] }
 0x627   :  { %v2816_v61 = vpop.eup %2815 }
 0x628   :  { %v2818_v0 = vpop.eup %2817  ;;  %v1274_v27 = vadd.f32 1.0, %v2816_v61  ;;  %v1671_v61 = vld [vmem:[%s3601_s5 + $0x48] sm:$0xff] }
 0x629   :  { %v1275_v3 = vadd.f32 1.0, %v2818_v0  ;;  %v2750_v0 = vpack.c.bf16 %v1671_v61, %v1670_v60 }
 0x62a   :  { %2819 = vrcp.f32 %v1274_v27  ;;  %v1672_v27 = vld [vmem:[%s3601_s5 + $0x50] sm:$0xff] }
 0x62b   :  { %2821 = vrcp.f32 %v1275_v3  ;;  %v1673_v3 = vld [vmem:[%s3601_s5 + $0x58] sm:$0xff] }
 0x62c   :  { %v2753_v1 = vpack.c.bf16 %v1673_v3, %v1672_v27 }
 0x634   :  { %v2820_v6 = vpop.eup %2819 }
 0x635   :  { %v2822_v17 = vpop.eup %2821  ;;  %v1284_v18 = vmul.f32 %v2820_v6, %v1282_v5  ;;  %v1674_v5 = vld [vmem:[%s3601_s5 + $0x60] sm:$0xff]  ;;  %v1675_v6 = vld [vmem:[%s3601_s5 + $0x68] sm:$0xff] }
 0x636   :  { %v1291_v20 = vmul.f32 %v2822_v17, %v1289_v12  ;;  %v1287_v23 = vsub.f32 1.0, %v2822_v17  ;;  %v2756_v12 = vpack.c.bf16 %v1675_v6, %v1674_v5  ;;  %v1676_v17 = vld [vmem:[%s3601_s5 + $0x70] sm:$0xff] }
 0x637   :  { %v1285_v21 = vadd.f32 %v1284_v18, %v3230_v11  ;;  %v1677_v18 = vld [vmem:[%s3601_s5 + $0x78] sm:$0xff] }
 0x639   :  { %2823 = vtanh.f32 %v1285_v21 }
 0x643   :  { %v2824_v24 = vpop.eup %2823 }
 0x644   :  { %v1288_v29 = vmul.f32 %v2824_v24, %v1287_v23 }
 0x646   :  { %v3462_v30 = vadd.f32 %v1291_v20, %v1288_v29  ;;  %v2759_v20 = vpack.c.bf16 %v1677_v18, %v1676_v17 }
 0x648   :  { %v1294_v31 = vrot.slane %v3462_v30, 5  ;;  %v3467_v32 = vsel %vm1655_vm6, %v3420_v43, %v3462_v30  ;;  %v1663_v43 = vld [vmem:[%s3601_s5 + $0x8] sm:$0xff] }
 0x649   :  { %v2738_v44 = vpack.c.bf16 %v1663_v43, %v1662_v41 }
 0x64a   :  { %1361 = vmatmul.mubr.f32.vlgmr.msra.gmra.mrb[12].mxu0 %v1294_v31  ;;  %2210 = vmatmul.mubr.f32.vlgmr.msra.gmra.mrb[16].mxu1 %v1294_v31 }
 0x64b   :  { %2684 = vmatpush1.bf16.msra.mxu0 %v2944_v8  ;;  %2715 = vmatpush3.bf16.msra.mxu1 %v3046_v45 }
 0x64c   :  { %2686 = vmatprep.subr.bf16.mxu0 %v2946_v9  ;;  %2716 = vmatprep.subr.bf16.mxu1 %v2874_v35 }
 0x64d   :  { %1537 = vmatprep.mubr.f32.mxu0 %v2873_v7  ;;  %2244 = vmatprep.mubr.msk.f32.mxu1 %vm2875_vm1, %v2873_v7 }
 0x64f   :  { %2688 = vmatpush1.bf16.msra.mxu0 %v2962_v14  ;;  %2718 = vmatpush3.bf16.msra.mxu1 %v3075_v54 }
 0x650   :  { %2690 = vmatprep.subr.bf16.mxu0 %v2965_v15  ;;  %2719 = vmatprep.subr.bf16.mxu1 %v2874_v35 }
 0x653   :  { %2692 = vmatpush1.bf16.msra.mxu0 %v2992_v25  ;;  %2721 = vmatpush3.bf16.msra.mxu1 %v3105_v63 }
 0x654   :  { %2694 = vmatprep.subr.bf16.mxu0 %v2998_v28  ;;  %2722 = vmatprep.subr.bf16.mxu1 %v2874_v35 }
 0x657   :  { %2696 = vmatpush1.bf16.msra.mxu0 %v3023_v38  ;;  %2724 = vmatpush3.bf16.msra.mxu1 %v3127_v10  ;;  %v1466_v10 = vrot.slane %v3462_v30, 7 }
 0x658   :  { %2698 = vmatprep.subr.bf16.mxu0 %v3029_v40  ;;  %2725 = vmatprep.subr.bf16.mxu1 %v2874_v35 }
 0x65b   :  { %2700 = vmatpush1.bf16.msra.mxu0 %v3056_v48  ;;  %2727 = vmatpush3.bf16.msra.mxu1 %v3141_v16 }
 0x65c   :  { %2702 = vmatprep.subr.bf16.mxu0 %v3059_v49  ;;  %2728 = vmatprep.subr.bf16.mxu1 %v2874_v35 }
 0x65f   :  { %2704 = vmatpush1.bf16.msra.mxu0 %v3087_v57  ;;  %2730 = vmatpush3.bf16.msra.mxu1 %v3153_v19 }
 0x660   :  { %2706 = vmatprep.subr.bf16.mxu0 %v3090_v58  ;;  %2731 = vmatprep.subr.bf16.mxu1 %v2874_v35 }
 0x663   :  { %2708 = vmatpush1.bf16.msra.mxu0 %v3115_v2  ;;  %2733 = vmatpush3.bf16.msra.mxu1 %v3167_v22 }
 0x664   :  { %2710 = vmatprep.subr.bf16.mxu0 %v3118_v4  ;;  %2734 = vmatprep.subr.bf16.mxu1 %v2874_v35 }
 0x667   :  { %2712 = vmatpush1.bf16.msra.mxu0 %v3137_v13  ;;  %2736 = vmatpush3.bf16.msra.mxu1 %v3179_v26 }
 0x668   :  { %2737 = vmatprep.subr.bf16.mxu0 %v2874_v35 }
 0x71d   :  { %v1362_v8 = vpop.f32.mrb[12].mxu0  ;;  %v1433_v9 = vpop.f32.mrb[16].mxu1 }
 0x71e   :  { %v1439_v14 = vrot.slane %v1362_v8, 2  ;;  %v1364_v15 = vpop.f32.mrb[13].mxu0  ;;  %v2211_v25 = vpop.f32.mrb[17].mxu1  ;;  %v1457_v63 = vadd.f32 %v1433_v9, %v3227_v62 }
 0x71f   :  { %v1440_v28 = vrot.slane %v1364_v15, 2 }
 0x720   :  { %v1443_v38 = vadd.f32 %v1439_v14, %v3218_v42  ;;  %v1459_v2 = vrot.slane %v1457_v63, 2 }
 0x721   :  { %v1444_v40 = vadd.f32 %v1440_v28, %v3221_v47 }
 0x722   :  { %v1799_v45 = vmul.f32 -1.442695, %v1443_v38 }
 0x723   :  { %v1800_v48 = vmul.f32 -1.442695, %v1444_v40 }
 0x724   :  { %2825 = vpow2.f32 %v1799_v45 }
 0x725   :  { %2827 = vpow2.f32 %v1800_v48 }
 0x72e   :  { %v2826_v49 = vpop.eup %2825 }
 0x72f   :  { %v2828_v54 = vpop.eup %2827  ;;  %v1451_v57 = vadd.f32 1.0, %v2826_v49 }
 0x730   :  { %v1452_v58 = vadd.f32 1.0, %v2828_v54 }
 0x731   :  { %2829 = vrcp.f32 %v1451_v57 }
 0x732   :  { %2831 = vrcp.f32 %v1452_v58 }
 0x73b   :  { %v2830_v4 = vpop.eup %2829 }
 0x73c   :  { %v2832_v13 = vpop.eup %2831  ;;  %v1461_v16 = vmul.f32 %v2830_v4, %v1459_v2 }
 0x73d   :  { %v1468_v19 = vmul.f32 %v2832_v13, %v1466_v10  ;;  %v1464_v26 = vsub.f32 1.0, %v2832_v13 }
 0x73e   :  { %v1462_v22 = vadd.f32 %v1461_v16, %v3230_v11 }
 0x740   :  { %2833 = vtanh.f32 %v1462_v22 }
 0x74a   :  { %v2834_v33 = vpop.eup %2833 }
 0x74b   :  { %v1465_v34 = vmul.f32 %v2834_v33, %v1464_v26 }
 0x74d   :  { %v3508_v36 = vadd.f32 %v1468_v19, %v1465_v34 }
 0x74f   :  { %v1471_v37 = vrot.slane %v3508_v36, 6  ;;  %v3513_v39 = vsel %vm1657_vm7, %v3467_v32, %v3508_v36  ;;  %v1643_v48 = vrot.slane %v3508_v36, 7 }
 0x751   :  { %1538 = vmatmul.mubr.f32.vlgmr.msra.gmra.mrb[14].mxu0 %v1471_v37  ;;  %2245 = vmatmul.mubr.f32.vlgmr.msra.gmra.mrb[18].mxu1 %v1471_v37 }
 0x752   :  { %2279 = vmatprep.mubr.msk.f32.mxu0 %vm2875_vm1, %v2873_v7  ;;  %2739 = vmatpush3.bf16.msra.mxu0 %v2738_v44  ;;  %v1665_v7 = vld [vmem:[%s3601_s5 + $0x18] sm:$0xff] }
 0x753   :  { %2740 = vmatprep.subr.bf16.mxu0 %v2874_v35  ;;  %v2741_v50 = vpack.c.bf16 %v1665_v7, %v1664_v46 }
 0x756   :  { %2742 = vmatpush3.bf16.msra.mxu0 %v2741_v50 }
 0x757   :  { %2743 = vmatprep.subr.bf16.mxu0 %v2874_v35 }
 0x75a   :  { %2745 = vmatpush3.bf16.msra.mxu0 %v2744_v53 }
 0x75b   :  { %2746 = vmatprep.subr.bf16.mxu0 %v2874_v35 }
 0x75e   :  { %2748 = vmatpush3.bf16.msra.mxu0 %v2747_v59 }
 0x75f   :  { %2749 = vmatprep.subr.bf16.mxu0 %v2874_v35 }
 0x762   :  { %2751 = vmatpush3.bf16.msra.mxu0 %v2750_v0 }
 0x763   :  { %2752 = vmatprep.subr.bf16.mxu0 %v2874_v35 }
 0x766   :  { %2754 = vmatpush3.bf16.msra.mxu0 %v2753_v1 }
 0x767   :  { %2755 = vmatprep.subr.bf16.mxu0 %v2874_v35 }
 0x76a   :  { %2757 = vmatpush3.bf16.msra.mxu0 %v2756_v12 }
 0x76b   :  { %2758 = vmatprep.subr.bf16.mxu0 %v2874_v35 }
 0x76e   :  { %2760 = vmatpush3.bf16.msra.mxu0 %v2759_v20 }
 0x824   :  { %v1539_v21 = vpop.f32.mrb[14].mxu0  ;;  %v1610_v23 = vpop.f32.mrb[18].mxu1 }
 0x825   :  { %v1616_v24 = vrot.slane %v1539_v21, 1  ;;  %v1541_v29 = vpop.f32.mrb[15].mxu0  ;;  %v2246_v30 = vpop.f32.mrb[19].mxu1  ;;  %v1634_v35 = vadd.f32 %v1610_v23, %v3227_v62  ;;  %v1803_v62 = vld [vmem:[%s3602_s6] ss:$0 sm:$0xff] }
 0x826   :  { %v1617_v31 = vrot.slane %v1541_v29, 1 }
 0x827   :  { %v1620_v32 = vadd.f32 %v1616_v24, %v3218_v42  ;;  %v1636_v40 = vrot.slane %v1634_v35, 1 }
 0x828   :  { %v1621_v8 = vadd.f32 %v1617_v31, %v3221_v47 }
 0x829   :  { %v1801_v9 = vmul.f32 -1.442695, %v1620_v32 }
 0x82a   :  { %v1802_v14 = vmul.f32 -1.442695, %v1621_v8 }
 0x82b   :  { %2835 = vpow2.f32 %v1801_v9 }
 0x82c   :  { %2837 = vpow2.f32 %v1802_v14 }
 0x835   :  { %v2836_v15 = vpop.eup %2835 }
 0x836   :  { %v2838_v25 = vpop.eup %2837  ;;  %v1628_v28 = vadd.f32 1.0, %v2836_v15 }
 0x837   :  { %v1629_v38 = vadd.f32 1.0, %v2838_v25 }
 0x838   :  { %2839 = vrcp.f32 %v1628_v28 }
 0x839   :  { %2841 = vrcp.f32 %v1629_v38 }
 0x842   :  { %v2840_v45 = vpop.eup %2839 }
 0x843   :  { %v2842_v49 = vpop.eup %2841  ;;  %v1638_v42 = vmul.f32 %v2840_v45, %v1636_v40 }
 0x844   :  { %v1645_v54 = vmul.f32 %v2842_v49, %v1643_v48  ;;  %v1641_v57 = vsub.f32 1.0, %v2842_v49 }
 0x845   :  { %v1639_v47 = vadd.f32 %v1638_v42, %v3230_v11 }
 0x847   :  { %2843 = vtanh.f32 %v1639_v47 }
 0x851   :  { %v2844_v58 = vpop.eup %2843 }
 0x852   :  { %v1642_v63 = vmul.f32 %v2844_v58, %v1641_v57 }
 0x854   :  { %v1646_v2 = vadd.f32 %v1645_v54, %v1642_v63 }
 0x856   :  { %v1660_v4 = vsel %vm1659_vm8, %v3513_v39, %v1646_v2  ;;  %1661 = vst [vmem:[%s3604_s8 - $0x7] sm:$0x80] %v1646_v2  ;;  %s2876_s8 = smov [#allocation2]  }
 0x857   :  { %2280 = vmatmul.mubr.f32.vlgmr.msra.gmra.mrb[16].mxu0 %v1660_v4  ;;  %s1773_s30 = sshll.u32 %s2876_s8, 4  ;;  %s1774_s30 = int_to_ptr.vmem [resolvable:$true] %s1773_s30 }
 0x858   :  { %s2849_s6 = scalar_lea.vmem %s1774_s30, 128  ;;  %p2854_p1 = scmp.lt.s32.totalorder %s1774_s30, %s1774_s30 }
 0x859   :  { %p2850_p0 = scmp.ne.s32.totalorder %s1774_s30, %s2849_s6  ;;  %p2855_p2 = scmp.lt.s32.totalorder %s2849_s6, %s2849_s6 }
 0x85b   :  { %p2856_p3 = por %p2855_p2, %p2854_p1 }
 0x85d   :  { %p2857_p4 = pnand %p2856_p3, %p2850_p0 }
 0x92a   :  { %v1751_v10 = vpop.f32.mrb[16].mxu0 }
 0x92b   :  { %v1752_v13 = vadd.f32 %v1803_v62, %v1751_v10  ;;  %v2281_v11 = vpop.f32.mrb[17].mxu0 }
 0x92d   :  { %1755 = vmax.xlane.f32.xlu0 %v1752_v13 }
 0x9ba   :  { %v1756_v16 = vpop.xlane.xlu0 %1755 }
 0x9bb   :  { %v1757_v19 = vsub.f32 %v1752_v13, %v1756_v16 }
 0x9bd   :  { %v1758_v22 = vmul.f32 1.442695, %v1757_v19 }
 0x9bf   :  { %2845 = vpow2.f32 %v1758_v22 }
 0x9c9   :  { %v2846_v26 = vpop.eup %2845 }
 0x9ca   :  { %1760 = vadd.xlane.f32.xlu0 %v2846_v26 }
 0xa57   :  { %v1761_v33 = vpop.xlane.xlu0 %1760 }
 0xa58   :  { %2847 = vlog2.f32 %v1761_v33 }
 0xa62   :  { %v2848_v34 = vpop.eup %2847 }
 0xa63   :  { %v1763_v36 = vmul.f32 0.6931472, %v2848_v34 }
 0xa65   :  { %v1764_v37 = vadd.f32 %v1763_v36, %v1756_v16 }
 0xa67   :  { %v1765_v39 = vsub.f32 %v1752_v13, %v1764_v37 }
 0xa69   :  { %1766 = vst [vmem:[#allocation2] sm:$0xff] %v1765_v39 }
 0xa6a   :  { %2860 = shalt.err (!%p2857_p4)
}
 0xa6b   :  { %s2861_s11 = scalar_lea.hbm %s3603_s7, 128 }
 0xa6c   :  { %p2862_p5 = scmp.ne.s32.totalorder %s3603_s7, %s2861_s11  ;;  %p2865_p6 = scmp.lt.u32.totalorder %s2861_s11, %s3603_s7 }
 0xa6e   :  { %p2867_p7 = pnand %p2865_p6, %p2862_p5 }
 0xa70   :  { %2870 = shalt.err (!%p2867_p7)
}
 0xa71   :  { %1776 = dma.vmem_to_hbm [thread:$0]  %s1774_s30, 128, %s3603_s7, [#allocation3]  }
 0xa72   :  { %2871 = dma.done.wait [#allocation3], 128  }
 0xa73   :  { %2872 = vsyncadd [#allocation3], 4294967168 }
 0xa74   :  { %1784 = vsyncpa [#allocation3], 1 }

</bundles_post_ra>
